<compile_context>
chip_gen: v7x
topology: tpu7x:2x2x1
jax: 0.10.0
libtpu: 0.0.40
codegen_flags: <defaults>
</compile_context>

<pallas_src>
from functools import partial

import numpy as np
import jax
import jax.numpy as jnp
from jax import lax
from jax.experimental import pallas as pl
from jax.experimental.pallas import tpu as pltpu

# Matmul operand dtype. Kept f32 here to hold the tight verification tolerance;
# on v6e/v7x set to jnp.bfloat16 (accumulation stays f32 via preferred_element_type)
# and loosen the test tolerance accordingly.
_MM_DTYPE = jnp.float32


def _activate(y, act):
    if act == "RE":
        return jnp.maximum(y, 0.0)
    # h_swish
    return y * jnp.clip(y + 3.0, 0.0, 6.0) * (1.0 / 6.0)


# ---------------------------------------------------------------------------
# Fused block kernel: one grid step = one image, everything stays in VMEM.
# ---------------------------------------------------------------------------
def _fused_block_kernel(*refs, H, W, K, stride, pad, Ho, Wo, exp,
                        act, expand, use_se, use_connect, mm_dtype):
    it = iter(refs)
    x_ref = next(it)                                   # (1, H*W, Cin)  spatial-major
    if expand:
        w1_ref, s1_ref, b1_ref = next(it), next(it), next(it)
    w2_ref, s2_ref, b2_ref = next(it), next(it), next(it)
    if use_se:
        sw1_ref, sb1_ref, sw2_ref, sb2_ref = next(it), next(it), next(it), next(it)
    w3_ref, s3_ref, b3_ref = next(it), next(it), next(it)
    r_ref = next(it) if use_connect else None          # (1, Cout, H*W) channel-major
    o_ref = next(it)                                   # (1, Cout, Ho*Wo) channel-major
    xp_ref = next(it)                                  # VMEM scratch (Hp, Wp, exp)

    xs = x_ref[0]                                      # (H*W, Cin)

    # ---- conv1 (1x1) + bn1 (prune mask folded into scale/shift) + act ------
    if expand:
        a = jnp.dot(xs.astype(mm_dtype), w1_ref[...].astype(mm_dtype),
                    preferred_element_type=jnp.float32)        # (H*W, exp)
        a = a * s1_ref[...] + b1_ref[...]
        a = _activate(a, act)
    else:
        a = xs                                         # Cin == exp in this case

    # ---- depthwise KxK + bn2 (mask folded), halo padded in VMEM ------------
    xp_ref[...] = jnp.zeros_like(xp_ref)               # zero halo (and interior)
    xp_ref[pl.ds(pad, H), pl.ds(pad, W), :] = a.reshape(H, W, exp)

    w2 = w2_ref[...]                                   # (K*K, exp)
    acc = jnp.zeros((Ho, Wo, exp), jnp.float32)
    if stride == 1:
        for kh in range(K):
            for kw in range(K):
                patch = xp_ref[pl.ds(kh, Ho), pl.ds(kw, Wo), :]
                acc = acc + patch * w2[kh * K + kw]
    else:
        xp = xp_ref[...]
        for kh in range(K):
            for kw in range(K):
                patch = lax.slice(
                    xp,
                    (kh, kw, 0),
                    (kh + (Ho - 1) * stride + 1, kw + (Wo - 1) * stride + 1, exp),
                    (stride, stride, 1),
                )
                acc = acc + patch * w2[kh * K + kw]

    y = acc.reshape(Ho * Wo, exp) * s2_ref[...] + b2_ref[...]   # (Ho*Wo, exp)

    # ---- SqueezeBlock (pool -> FC+ReLU -> FC+h_sigmoid -> scale) or act ----
    if use_se:
        pooled = jnp.sum(y, axis=0, keepdims=True) * (1.0 / (Ho * Wo))   # (1, exp)
        h1 = jnp.dot(pooled.astype(mm_dtype), sw1_ref[...].astype(mm_dtype),
                     preferred_element_type=jnp.float32) + sb1_ref[...]
        h1 = jnp.maximum(h1, 0.0)
        h2 = jnp.dot(h1.astype(mm_dtype), sw2_ref[...].astype(mm_dtype),
                     preferred_element_type=jnp.float32) + sb2_ref[...]
        gate = jnp.clip(h2 + 3.0, 0.0, 6.0) * (1.0 / 6.0)                # h_sigmoid
        y = y * gate
    else:
        y = _activate(y, act)

    # ---- conv3 (1x1) to CHANNEL-major + bn3 + residual ----------------------
    # out_cm[o, r] = sum_e w3t[o, e] * y[r, e]  (transposed-RHS dot -> lane-dense output)
    out_cm = lax.dot_general(w3_ref[...].astype(mm_dtype), y.astype(mm_dtype),
                             dimension_numbers=(((1,), (1,)), ((), ())),
                             preferred_element_type=jnp.float32)          # (Cout, Ho*Wo)
    out_cm = out_cm * s3_ref[...] + b3_ref[...]        # (Cout,1) broadcast along lanes
    if use_connect:
        out_cm = out_cm + r_ref[0]                     # residual already NCHW-flat
    o_ref[0] = out_cm


# ---------------------------------------------------------------------------
# Host-side wrapper: BN folding, arg/spec assembly, NCHW-native I/O
# ---------------------------------------------------------------------------
def bn_fold(gamma, beta, mean, var, eps=1e-5):
    scale = gamma / jnp.sqrt(var + eps)
    shift = beta - mean * scale
    return scale, shift


def block_forward(x_nchw, p, cfg):
    N, Cin, H, W = x_nchw.shape
    exp, Cout, K, stride = cfg["exp"], cfg["out"], cfg["k"], cfg["stride"]
    act, expand = cfg["act"], cfg["expand"]
    use_se, use_connect = cfg["SE"], cfg["use_connect"]

    pad = (K - 1) // 2
    Ho = (H + 2 * pad - K) // stride + 1
    Wo = (W + 2 * pad - K) // stride + 1
    R, Ro = H * W, Ho * Wo
    Hp, Wp = H + 2 * pad, W + 2 * pad

    x = x_nchw.astype(jnp.float32)
    x_cm = x.reshape(N, Cin, R)                  # NCHW flat (channel-major): free reshape
    x_sp = jnp.transpose(x_cm, (0, 2, 1))        # (N, H*W, Cin) for the 1x1 matmul (tiny)

    mask = p["channel_mask"]                     # all-ones on the first forward

    args = [x_sp]
    specs = [pl.BlockSpec((1, R, Cin), lambda n: (n, 0, 0))]

    def add_const(arr):
        shp = arr.shape
        args.append(arr)
        specs.append(pl.BlockSpec(shp, lambda n: (0,) * len(shp)))

    if expand:
        s1, b1 = bn_fold(*p["bn1"])
        s1, b1 = s1 * mask, b1 * mask            # fold prune mask into BN affine
        add_const(p["conv1_w"])                  # (Cin, exp)
        add_const(s1.reshape(1, exp))
        add_const(b1.reshape(1, exp))

    s2, b2 = bn_fold(*p["bn2"])
    s2, b2 = s2 * mask, b2 * mask
    add_const(p["conv2_w"])                      # (K*K, exp)
    add_const(s2.reshape(1, exp))
    add_const(b2.reshape(1, exp))

    if use_se:
        add_const(p["se_w1"])                    # (exp, exp//4)
        add_const(p["se_b1"].reshape(1, -1))
        add_const(p["se_w2"])                    # (exp//4, exp)
        add_const(p["se_b2"].reshape(1, exp))

    s3, b3 = bn_fold(*p["bn3"])
    add_const(p["conv3_wt"])                     # (Cout, exp)
    add_const(s3.reshape(Cout, 1))
    add_const(b3.reshape(Cout, 1))

    if use_connect:
        args.append(x_cm)                        # residual streamed in NCHW layout
        specs.append(pl.BlockSpec((1, Cout, Ro), lambda n: (n, 0, 0)))

    kernel = partial(_fused_block_kernel,
                     H=H, W=W, K=K, stride=stride, pad=pad, Ho=Ho, Wo=Wo, exp=exp,
                     act=act, expand=expand, use_se=use_se, use_connect=use_connect,
                     mm_dtype=_MM_DTYPE)

    out = pl.pallas_call(
        kernel,
        out_shape=jax.ShapeDtypeStruct((N, Cout, Ro), jnp.float32),
        grid=(N,),
        in_specs=specs,
        out_specs=pl.BlockSpec((1, Cout, Ro), lambda n: (n, 0, 0)),
        scratch_shapes=[pltpu.VMEM((Hp, Wp, exp), jnp.float32)],
        compiler_params=pltpu.CompilerParams(
            dimension_semantics=("parallel",),          # v7x: split batch across 2 TCs
            vmem_limit_bytes=32 * 1024 * 1024,
        ),
    )(*args)

    return out.reshape(N, Cout, Ho, Wo)          # already NCHW layout -> free reshape


# ---------------------------------------------------------------------------
# Pure-JAX reference (NCHW, mirrors the PyTorch forward) for verification
# ---------------------------------------------------------------------------
def reference_forward(x, p, cfg):
    eps = 1e-5

    def bn(z, stats):
        g, b, m, v = stats
        return ((z - m.reshape(1, -1, 1, 1)) / jnp.sqrt(v.reshape(1, -1, 1, 1) + eps)
                * g.reshape(1, -1, 1, 1) + b.reshape(1, -1, 1, 1))

    def act(z):
        if cfg["act"] == "RE":
            return jnp.maximum(z, 0.0)
        return z * jnp.clip(z + 3.0, 0.0, 6.0) / 6.0

    out = x
    if cfg["expand"]:
        out = lax.conv_general_dilated(out, p["conv1_w_oihw"], (1, 1), "VALID",
                                       dimension_numbers=("NCHW", "OIHW", "NCHW"))
        out = act(bn(out, p["bn1"]))
    pad = (cfg["k"] - 1) // 2
    out = lax.conv_general_dilated(out, p["conv2_w_oihw"],
                                   (cfg["stride"], cfg["stride"]),
                                   [(pad, pad), (pad, pad)],
                                   dimension_numbers=("NCHW", "OIHW", "NCHW"),
                                   feature_group_count=cfg["exp"])
    out = bn(out, p["bn2"])
    if cfg["SE"]:
        pooled = jnp.mean(out, axis=(2, 3))                        # (N, C)
        h1 = jnp.maximum(pooled @ p["se_w1"] + p["se_b1"], 0.0)
        h2 = h1 @ p["se_w2"] + p["se_b2"]
        gate = jnp.clip(h2 + 3.0, 0.0, 6.0) / 6.0
        out = out * gate[:, :, None, None]
    else:
        out = act(out)
    out = lax.conv_general_dilated(out, p["conv3_w_oihw"], (1, 1), "VALID",
                                   dimension_numbers=("NCHW", "OIHW", "NCHW"))
    out = bn(out, p["bn3"])
    if cfg["use_connect"]:
        out = x + out
    return out


# ---------------------------------------------------------------------------
# Deterministic parameter construction
# ---------------------------------------------------------------------------
def make_params(key, cfg):
    Cin, Cout, exp, K = cfg["in"], cfg["out"], cfg["exp"], cfg["k"]
    ks = jax.random.split(key, 20)

    def bn_stats(k, c):
        k1, k2, k3, k4 = jax.random.split(k, 4)
        gamma = 1.0 + 0.1 * jax.random.normal(k1, (c,), jnp.float32)
        beta = 0.1 * jax.random.normal(k2, (c,), jnp.float32)
        mean = 0.1 * jax.random.normal(k3, (c,), jnp.float32)
        var = 0.5 + jnp.abs(jax.random.normal(k4, (c,), jnp.float32))
        return (gamma, beta, mean, var)

    conv1_oihw = 0.2 * jax.random.normal(ks[0], (exp, Cin, 1, 1), jnp.float32)
    conv2_oihw = 0.2 * jax.random.normal(ks[1], (exp, 1, K, K), jnp.float32)
    conv3_oihw = 0.2 * jax.random.normal(ks[2], (Cout, exp, 1, 1), jnp.float32)
    se_w1 = 0.2 * jax.random.normal(ks[3], (exp, exp // 4), jnp.float32)
    se_b1 = 0.1 * jax.random.normal(ks[4], (exp // 4,), jnp.float32)
    se_w2 = 0.2 * jax.random.normal(ks[5], (exp // 4, exp), jnp.float32)
    se_b2 = 0.1 * jax.random.normal(ks[6], (exp,), jnp.float32)

    return {
        # OIHW originals (reference)
        "conv1_w_oihw": conv1_oihw,
        "conv2_w_oihw": conv2_oihw,
        "conv3_w_oihw": conv3_oihw,
        # kernel layouts
        "conv1_w": conv1_oihw[:, :, 0, 0].T,                       # (Cin, exp)
        "conv2_w": conv2_oihw[:, 0].reshape(exp, K * K).T,         # (K*K, exp)
        "conv3_wt": conv3_oihw[:, :, 0, 0],                        # (Cout, exp)
        "bn1": bn_stats(ks[7], exp),
        "bn2": bn_stats(ks[8], exp),
        "bn3": bn_stats(ks[9], Cout),
        "se_w1": se_w1, "se_b1": se_b1, "se_w2": se_w2, "se_b2": se_b2,
        # first-call forward: indicator not yet computed -> all-ones mask
        "channel_mask": jnp.ones((exp,), jnp.float32),
    }


if __name__ == "__main__":
    cfg = {
        "in": 16, "out": 16, "k": 3, "stride": 1, "exp": 64,
        "expand": True,          # exp_size != in_channels
        "SE": True, "act": "HS",  # nonLinear='HS' -> h_swish
        "use_connect": True,     # stride==1 and in==out
        "group_size": 16,
    }

    key = jax.random.PRNGKey(0)
    kx, kp = jax.random.split(key)
    x = jax.random.normal(kx, (2, cfg["in"], 16, 16), jnp.float32)   # NCHW input
    params = make_params(kp, cfg)

    out = jax.block_until_ready(block_forward(x, params, cfg))
    ref = jax.block_until_ready(reference_forward(x, params, cfg))

    np.testing.assert_allclose(np.asarray(out), np.asarray(ref), rtol=2e-3, atol=5e-4)
    print("KERNEL_OK")
</pallas_src>

<mosaic_0001>
module attributes {stable_mosaic.version = 11 : i64} {
  func.func @_fused_block_kernel(%arg0: i32, %arg1: memref<1x256x16xf32, #tpu.memory_space<vmem>>, %arg2: memref<16x64xf32, #tpu.memory_space<vmem>>, %arg3: memref<1x64xf32, #tpu.memory_space<vmem>>, %arg4: memref<1x64xf32, #tpu.memory_space<vmem>>, %arg5: memref<9x64xf32, #tpu.memory_space<vmem>>, %arg6: memref<1x64xf32, #tpu.memory_space<vmem>>, %arg7: memref<1x64xf32, #tpu.memory_space<vmem>>, %arg8: memref<64x16xf32, #tpu.memory_space<vmem>>, %arg9: memref<1x16xf32, #tpu.memory_space<vmem>>, %arg10: memref<16x64xf32, #tpu.memory_space<vmem>>, %arg11: memref<1x64xf32, #tpu.memory_space<vmem>>, %arg12: memref<16x64xf32, #tpu.memory_space<vmem>>, %arg13: memref<16x1xf32, #tpu.memory_space<vmem>>, %arg14: memref<16x1xf32, #tpu.memory_space<vmem>>, %arg15: memref<1x16x256xf32, #tpu.memory_space<vmem>>, %arg16: memref<1x16x256xf32, #tpu.memory_space<vmem>>, %arg17: memref<18x18x64xf32, #tpu.memory_space<vmem>>) attributes {dimension_semantics = [#tpu.dimension_semantics<parallel>], iteration_bounds = array<i64: 2>, scalar_prefetch = 0 : i64, scratch_operands = 1 : i64, tpu.core_type = #tpu.core_type<tc>, window_params = [{transform_indices = @transform_0, window_bounds = array<i64: 1, 256, 16>}, {pipeline_mode = #tpu.pipeline_mode<synchronous>, transform_indices = @transform_1, window_bounds = array<i64: 16, 64>}, {pipeline_mode = #tpu.pipeline_mode<synchronous>, transform_indices = @transform_2, window_bounds = array<i64: 1, 64>}, {pipeline_mode = #tpu.pipeline_mode<synchronous>, transform_indices = @transform_3, window_bounds = array<i64: 1, 64>}, {pipeline_mode = #tpu.pipeline_mode<synchronous>, transform_indices = @transform_4, window_bounds = array<i64: 9, 64>}, {pipeline_mode = #tpu.pipeline_mode<synchronous>, transform_indices = @transform_5, window_bounds = array<i64: 1, 64>}, {pipeline_mode = #tpu.pipeline_mode<synchronous>, transform_indices = @transform_6, window_bounds = array<i64: 1, 64>}, {pipeline_mode = #tpu.pipeline_mode<synchronous>, transform_indices = @transform_7, window_bounds = array<i64: 64, 16>}, {pipeline_mode = #tpu.pipeline_mode<synchronous>, transform_indices = @transform_8, window_bounds = array<i64: 1, 16>}, {pipeline_mode = #tpu.pipeline_mode<synchronous>, transform_indices = @transform_9, window_bounds = array<i64: 16, 64>}, {pipeline_mode = #tpu.pipeline_mode<synchronous>, transform_indices = @transform_10, window_bounds = array<i64: 1, 64>}, {pipeline_mode = #tpu.pipeline_mode<synchronous>, transform_indices = @transform_11, window_bounds = array<i64: 16, 64>}, {pipeline_mode = #tpu.pipeline_mode<synchronous>, transform_indices = @transform_12, window_bounds = array<i64: 16, 1>}, {pipeline_mode = #tpu.pipeline_mode<synchronous>, transform_indices = @transform_13, window_bounds = array<i64: 16, 1>}, {transform_indices = @transform_14, window_bounds = array<i64: 1, 16, 256>}, {transform_indices = @transform_15, window_bounds = array<i64: 1, 16, 256>}]} {
    %c0 = arith.constant 0 : index
    %c0_0 = arith.constant 0 : index
    %c0_1 = arith.constant 0 : index
    %0 = vector.load %arg1[%c0, %c0_0, %c0_1] : memref<1x256x16xf32, #tpu.memory_space<vmem>>, vector<1x256x16xf32>
    %1 = vector.shape_cast %0 : vector<1x256x16xf32> to vector<256x16xf32>
    %c0_2 = arith.constant 0 : index
    %c0_3 = arith.constant 0 : index
    %2 = vector.load %arg2[%c0_2, %c0_3] : memref<16x64xf32, #tpu.memory_space<vmem>>, vector<16x64xf32>
    %cst = arith.constant dense<0.000000e+00> : vector<256x64xf32>
    %3 = tpu.matmul %1, %2, %cst {dimension_numbers = #tpu.dot_dimension_numbers<[1], [0], [0], [1], [0, 0, 1, 1], [], []>} : vector<256x16xf32>, vector<16x64xf32>, vector<256x64xf32> -> vector<256x64xf32>
    %c0_4 = arith.constant 0 : index
    %c0_5 = arith.constant 0 : index
    %4 = vector.load %arg3[%c0_4, %c0_5] : memref<1x64xf32, #tpu.memory_space<vmem>>, vector<1x64xf32>
    %5 = vector.broadcast %4 : vector<1x64xf32> to vector<256x64xf32>
    %6 = arith.mulf %3, %5 : vector<256x64xf32>
    %c0_6 = arith.constant 0 : index
    %c0_7 = arith.constant 0 : index
    %7 = vector.load %arg4[%c0_6, %c0_7] : memref<1x64xf32, #tpu.memory_space<vmem>>, vector<1x64xf32>
    %8 = vector.broadcast %7 : vector<1x64xf32> to vector<256x64xf32>
    %9 = arith.addf %6, %8 : vector<256x64xf32>
    %cst_8 = arith.constant 3.000000e+00 : f32
    %10 = vector.broadcast %cst_8 : f32 to vector<256x64xf32>
    %11 = arith.addf %9, %10 : vector<256x64xf32>
    %cst_9 = arith.constant 0.000000e+00 : f32
    %cst_10 = arith.constant 6.000000e+00 : f32
    %12 = vector.broadcast %cst_9 : f32 to vector<256x64xf32>
    %13 = arith.maximumf %12, %11 : vector<256x64xf32>
    %14 = vector.broadcast %cst_10 : f32 to vector<256x64xf32>
    %15 = arith.minimumf %14, %13 : vector<256x64xf32>
    %16 = arith.mulf %9, %15 : vector<256x64xf32>
    %cst_11 = arith.constant 0.166666672 : f32
    %17 = vector.broadcast %cst_11 : f32 to vector<256x64xf32>
    %18 = arith.mulf %16, %17 : vector<256x64xf32>
    %cst_12 = arith.constant 0.000000e+00 : f32
    %19 = vector.broadcast %cst_12 : f32 to vector<18x18x64xf32>
    %c0_13 = arith.constant 0 : index
    %c0_14 = arith.constant 0 : index
    %c0_15 = arith.constant 0 : index
    %20 = vector.load %arg17[%c0_13, %c0_14, %c0_15] : memref<18x18x64xf32, #tpu.memory_space<vmem>>, vector<18x18x64xf32>
    tpu.vector_store %arg17[%c0_13, %c0_14, %c0_15], %19 {strides = array<i32>} : memref<18x18x64xf32, #tpu.memory_space<vmem>>, vector<18x18x64xf32>,
    %21 = vector.shape_cast %18 : vector<256x64xf32> to vector<16x16x64xf32>
    %c1 = arith.constant 1 : index
    %c1_16 = arith.constant 1 : index
    %c0_17 = arith.constant 0 : index
    %22 = vector.load %arg17[%c1, %c1_16, %c0_17] : memref<18x18x64xf32, #tpu.memory_space<vmem>>, vector<16x16x64xf32>
    tpu.vector_store %arg17[%c1, %c1_16, %c0_17], %21 {strides = array<i32>} : memref<18x18x64xf32, #tpu.memory_space<vmem>>, vector<16x16x64xf32>,
    %c0_18 = arith.constant 0 : index
    %c0_19 = arith.constant 0 : index
    %23 = vector.load %arg5[%c0_18, %c0_19] : memref<9x64xf32, #tpu.memory_space<vmem>>, vector<9x64xf32>
    %cst_20 = arith.constant 0.000000e+00 : f32
    %24 = vector.broadcast %cst_20 : f32 to vector<16x16x64xf32>
    %c0_21 = arith.constant 0 : index
    %c0_22 = arith.constant 0 : index
    %c0_23 = arith.constant 0 : index
    %25 = vector.load %arg17[%c0_21, %c0_22, %c0_23] : memref<18x18x64xf32, #tpu.memory_space<vmem>>, vector<16x16x64xf32>
    %26 = vector.extract_strided_slice %23 {offsets = [0, 0], sizes = [1, 64], strides = [1, 1]} : vector<9x64xf32> to vector<1x64xf32>
    %27 = vector.shape_cast %26 : vector<1x64xf32> to vector<64xf32>
    %28 = vector.shape_cast %27 : vector<64xf32> to vector<1x1x64xf32>
    %29 = vector.broadcast %28 : vector<1x1x64xf32> to vector<16x16x64xf32>
    %30 = arith.mulf %25, %29 : vector<16x16x64xf32>
    %31 = arith.addf %24, %30 : vector<16x16x64xf32>
    %c0_24 = arith.constant 0 : index
    %c1_25 = arith.constant 1 : index
    %c0_26 = arith.constant 0 : index
    %32 = vector.load %arg17[%c0_24, %c1_25, %c0_26] : memref<18x18x64xf32, #tpu.memory_space<vmem>>, vector<16x16x64xf32>
    %33 = vector.extract_strided_slice %23 {offsets = [1, 0], sizes = [1, 64], strides = [1, 1]} : vector<9x64xf32> to vector<1x64xf32>
    %34 = vector.shape_cast %33 : vector<1x64xf32> to vector<64xf32>
    %35 = vector.shape_cast %34 : vector<64xf32> to vector<1x1x64xf32>
    %36 = vector.broadcast %35 : vector<1x1x64xf32> to vector<16x16x64xf32>
    %37 = arith.mulf %32, %36 : vector<16x16x64xf32>
    %38 = arith.addf %31, %37 : vector<16x16x64xf32>
    %c0_27 = arith.constant 0 : index
    %c2 = arith.constant 2 : index
    %c0_28 = arith.constant 0 : index
    %39 = vector.load %arg17[%c0_27, %c2, %c0_28] : memref<18x18x64xf32, #tpu.memory_space<vmem>>, vector<16x16x64xf32>
    %40 = vector.extract_strided_slice %23 {offsets = [2, 0], sizes = [1, 64], strides = [1, 1]} : vector<9x64xf32> to vector<1x64xf32>
    %41 = vector.shape_cast %40 : vector<1x64xf32> to vector<64xf32>
    %42 = vector.shape_cast %41 : vector<64xf32> to vector<1x1x64xf32>
    %43 = vector.broadcast %42 : vector<1x1x64xf32> to vector<16x16x64xf32>
    %44 = arith.mulf %39, %43 : vector<16x16x64xf32>
    %45 = arith.addf %38, %44 : vector<16x16x64xf32>
    %c1_29 = arith.constant 1 : index
    %c0_30 = arith.constant 0 : index
    %c0_31 = arith.constant 0 : index
    %46 = vector.load %arg17[%c1_29, %c0_30, %c0_31] : memref<18x18x64xf32, #tpu.memory_space<vmem>>, vector<16x16x64xf32>
    %47 = vector.extract_strided_slice %23 {offsets = [3, 0], sizes = [1, 64], strides = [1, 1]} : vector<9x64xf32> to vector<1x64xf32>
    %48 = vector.shape_cast %47 : vector<1x64xf32> to vector<64xf32>
    %49 = vector.shape_cast %48 : vector<64xf32> to vector<1x1x64xf32>
    %50 = vector.broadcast %49 : vector<1x1x64xf32> to vector<16x16x64xf32>
    %51 = arith.mulf %46, %50 : vector<16x16x64xf32>
    %52 = arith.addf %45, %51 : vector<16x16x64xf32>
    %c1_32 = arith.constant 1 : index
    %c1_33 = arith.constant 1 : index
    %c0_34 = arith.constant 0 : index
    %53 = vector.load %arg17[%c1_32, %c1_33, %c0_34] : memref<18x18x64xf32, #tpu.memory_space<vmem>>, vector<16x16x64xf32>
    %54 = vector.extract_strided_slice %23 {offsets = [4, 0], sizes = [1, 64], strides = [1, 1]} : vector<9x64xf32> to vector<1x64xf32>
    %55 = vector.shape_cast %54 : vector<1x64xf32> to vector<64xf32>
    %56 = vector.shape_cast %55 : vector<64xf32> to vector<1x1x64xf32>
    %57 = vector.broadcast %56 : vector<1x1x64xf32> to vector<16x16x64xf32>
    %58 = arith.mulf %53, %57 : vector<16x16x64xf32>
    %59 = arith.addf %52, %58 : vector<16x16x64xf32>
    %c1_35 = arith.constant 1 : index
    %c2_36 = arith.constant 2 : index
    %c0_37 = arith.constant 0 : index
    %60 = vector.load %arg17[%c1_35, %c2_36, %c0_37] : memref<18x18x64xf32, #tpu.memory_space<vmem>>, vector<16x16x64xf32>
    %61 = vector.extract_strided_slice %23 {offsets = [5, 0], sizes = [1, 64], strides = [1, 1]} : vector<9x64xf32> to vector<1x64xf32>
    %62 = vector.shape_cast %61 : vector<1x64xf32> to vector<64xf32>
    %63 = vector.shape_cast %62 : vector<64xf32> to vector<1x1x64xf32>
    %64 = vector.broadcast %63 : vector<1x1x64xf32> to vector<16x16x64xf32>
    %65 = arith.mulf %60, %64 : vector<16x16x64xf32>
    %66 = arith.addf %59, %65 : vector<16x16x64xf32>
    %c2_38 = arith.constant 2 : index
    %c0_39 = arith.constant 0 : index
    %c0_40 = arith.constant 0 : index
    %67 = vector.load %arg17[%c2_38, %c0_39, %c0_40] : memref<18x18x64xf32, #tpu.memory_space<vmem>>, vector<16x16x64xf32>
    %68 = vector.extract_strided_slice %23 {offsets = [6, 0], sizes = [1, 64], strides = [1, 1]} : vector<9x64xf32> to vector<1x64xf32>
    %69 = vector.shape_cast %68 : vector<1x64xf32> to vector<64xf32>
    %70 = vector.shape_cast %69 : vector<64xf32> to vector<1x1x64xf32>
    %71 = vector.broadcast %70 : vector<1x1x64xf32> to vector<16x16x64xf32>
    %72 = arith.mulf %67, %71 : vector<16x16x64xf32>
    %73 = arith.addf %66, %72 : vector<16x16x64xf32>
    %c2_41 = arith.constant 2 : index
    %c1_42 = arith.constant 1 : index
    %c0_43 = arith.constant 0 : index
    %74 = vector.load %arg17[%c2_41, %c1_42, %c0_43] : memref<18x18x64xf32, #tpu.memory_space<vmem>>, vector<16x16x64xf32>
    %75 = vector.extract_strided_slice %23 {offsets = [7, 0], sizes = [1, 64], strides = [1, 1]} : vector<9x64xf32> to vector<1x64xf32>
    %76 = vector.shape_cast %75 : vector<1x64xf32> to vector<64xf32>
    %77 = vector.shape_cast %76 : vector<64xf32> to vector<1x1x64xf32>
    %78 = vector.broadcast %77 : vector<1x1x64xf32> to vector<16x16x64xf32>
    %79 = arith.mulf %74, %78 : vector<16x16x64xf32>
    %80 = arith.addf %73, %79 : vector<16x16x64xf32>
    %c2_44 = arith.constant 2 : index
    %c2_45 = arith.constant 2 : index
    %c0_46 = arith.constant 0 : index
    %81 = vector.load %arg17[%c2_44, %c2_45, %c0_46] : memref<18x18x64xf32, #tpu.memory_space<vmem>>, vector<16x16x64xf32>
    %82 = vector.extract_strided_slice %23 {offsets = [8, 0], sizes = [1, 64], strides = [1, 1]} : vector<9x64xf32> to vector<1x64xf32>
    %83 = vector.shape_cast %82 : vector<1x64xf32> to vector<64xf32>
    %84 = vector.shape_cast %83 : vector<64xf32> to vector<1x1x64xf32>
    %85 = vector.broadcast %84 : vector<1x1x64xf32> to vector<16x16x64xf32>
    %86 = arith.mulf %81, %85 : vector<16x16x64xf32>
    %87 = arith.addf %80, %86 : vector<16x16x64xf32>
    %88 = vector.shape_cast %87 : vector<16x16x64xf32> to vector<256x64xf32>
    %c0_47 = arith.constant 0 : index
    %c0_48 = arith.constant 0 : index
    %89 = vector.load %arg6[%c0_47, %c0_48] : memref<1x64xf32, #tpu.memory_space<vmem>>, vector<1x64xf32>
    %90 = vector.broadcast %89 : vector<1x64xf32> to vector<256x64xf32>
    %91 = arith.mulf %88, %90 : vector<256x64xf32>
    %c0_49 = arith.constant 0 : index
    %c0_50 = arith.constant 0 : index
    %92 = vector.load %arg7[%c0_49, %c0_50] : memref<1x64xf32, #tpu.memory_space<vmem>>, vector<1x64xf32>
    %93 = vector.broadcast %92 : vector<1x64xf32> to vector<256x64xf32>
    %94 = arith.addf %91, %93 : vector<256x64xf32>
    %cst_51 = arith.constant dense<0.000000e+00> : vector<64xf32>
    %95 = vector.multi_reduction <add>, %94, %cst_51 [0] : vector<256x64xf32> to vector<64xf32>
    %96 = vector.shape_cast %95 : vector<64xf32> to vector<1x64xf32>
    %cst_52 = arith.constant 3.906250e-03 : f32
    %97 = vector.broadcast %cst_52 : f32 to vector<1x64xf32>
    %98 = arith.mulf %96, %97 : vector<1x64xf32>
    %c0_53 = arith.constant 0 : index
    %c0_54 = arith.constant 0 : index
    %99 = vector.load %arg8[%c0_53, %c0_54] : memref<64x16xf32, #tpu.memory_space<vmem>>, vector<64x16xf32>
    %cst_55 = arith.constant dense<0.000000e+00> : vector<1x16xf32>
    %100 = tpu.matmul %98, %99, %cst_55 {dimension_numbers = #tpu.dot_dimension_numbers<[1], [0], [0], [1], [0, 0, 1, 1], [], []>} : vector<1x64xf32>, vector<64x16xf32>, vector<1x16xf32> -> vector<1x16xf32>
    %c0_56 = arith.constant 0 : index
    %c0_57 = arith.constant 0 : index
    %101 = vector.load %arg9[%c0_56, %c0_57] : memref<1x16xf32, #tpu.memory_space<vmem>>, vector<1x16xf32>
    %102 = arith.addf %100, %101 : vector<1x16xf32>
    %cst_58 = arith.constant 0.000000e+00 : f32
    %103 = vector.broadcast %cst_58 : f32 to vector<1x16xf32>
    %104 = arith.maximumf %102, %103 : vector<1x16xf32>
    %c0_59 = arith.constant 0 : index
    %c0_60 = arith.constant 0 : index
    %105 = vector.load %arg10[%c0_59, %c0_60] : memref<16x64xf32, #tpu.memory_space<vmem>>, vector<16x64xf32>
    %cst_61 = arith.constant dense<0.000000e+00> : vector<1x64xf32>
    %106 = tpu.matmul %104, %105, %cst_61 {dimension_numbers = #tpu.dot_dimension_numbers<[1], [0], [0], [1], [0, 0, 1, 1], [], []>} : vector<1x16xf32>, vector<16x64xf32>, vector<1x64xf32> -> vector<1x64xf32>
    %c0_62 = arith.constant 0 : index
    %c0_63 = arith.constant 0 : index
    %107 = vector.load %arg11[%c0_62, %c0_63] : memref<1x64xf32, #tpu.memory_space<vmem>>, vector<1x64xf32>
    %108 = arith.addf %106, %107 : vector<1x64xf32>
    %cst_64 = arith.constant 3.000000e+00 : f32
    %109 = vector.broadcast %cst_64 : f32 to vector<1x64xf32>
    %110 = arith.addf %108, %109 : vector<1x64xf32>
    %cst_65 = arith.constant 0.000000e+00 : f32
    %cst_66 = arith.constant 6.000000e+00 : f32
    %111 = vector.broadcast %cst_65 : f32 to vector<1x64xf32>
    %112 = arith.maximumf %111, %110 : vector<1x64xf32>
    %113 = vector.broadcast %cst_66 : f32 to vector<1x64xf32>
    %114 = arith.minimumf %113, %112 : vector<1x64xf32>
    %cst_67 = arith.constant 0.166666672 : f32
    %115 = vector.broadcast %cst_67 : f32 to vector<1x64xf32>
    %116 = arith.mulf %114, %115 : vector<1x64xf32>
    %117 = vector.broadcast %116 : vector<1x64xf32> to vector<256x64xf32>
    %118 = arith.mulf %94, %117 : vector<256x64xf32>
    %c0_68 = arith.constant 0 : index
    %c0_69 = arith.constant 0 : index
    %119 = vector.load %arg12[%c0_68, %c0_69] : memref<16x64xf32, #tpu.memory_space<vmem>>, vector<16x64xf32>
    %cst_70 = arith.constant dense<0.000000e+00> : vector<16x256xf32>
    %120 = tpu.matmul %119, %118, %cst_70 {dimension_numbers = #tpu.dot_dimension_numbers<[1], [1], [0], [0], [0, 0, 1, 0], [], []>} : vector<16x64xf32>, vector<256x64xf32>, vector<16x256xf32> -> vector<16x256xf32>
    %c0_71 = arith.constant 0 : index
    %c0_72 = arith.constant 0 : index
    %121 = vector.load %arg13[%c0_71, %c0_72] : memref<16x1xf32, #tpu.memory_space<vmem>>, vector<16x1xf32>
    %122 = vector.broadcast %121 : vector<16x1xf32> to vector<16x256xf32>
    %123 = arith.mulf %120, %122 : vector<16x256xf32>
    %c0_73 = arith.constant 0 : index
    %c0_74 = arith.constant 0 : index
    %124 = vector.load %arg14[%c0_73, %c0_74] : memref<16x1xf32, #tpu.memory_space<vmem>>, vector<16x1xf32>
    %125 = vector.broadcast %124 : vector<16x1xf32> to vector<16x256xf32>
    %126 = arith.addf %123, %125 : vector<16x256xf32>
    %c0_75 = arith.constant 0 : index
    %c0_76 = arith.constant 0 : index
    %c0_77 = arith.constant 0 : index
    %127 = vector.load %arg15[%c0_75, %c0_76, %c0_77] : memref<1x16x256xf32, #tpu.memory_space<vmem>>, vector<1x16x256xf32>
    %128 = vector.shape_cast %127 : vector<1x16x256xf32> to vector<16x256xf32>
    %129 = arith.addf %126, %128 : vector<16x256xf32>
    %c0_78 = arith.constant 0 : index
    %c0_79 = arith.constant 0 : index
    %c0_80 = arith.constant 0 : index
    %130 = vector.load %arg16[%c0_78, %c0_79, %c0_80] : memref<1x16x256xf32, #tpu.memory_space<vmem>>, vector<1x16x256xf32>
    %131 = vector.shape_cast %130 : vector<1x16x256xf32> to vector<16x256xf32>
    %132 = vector.shape_cast %129 : vector<16x256xf32> to vector<1x16x256xf32>
    tpu.vector_store %arg16[%c0_78, %c0_79, %c0_80], %132 {strides = array<i32>} : memref<1x16x256xf32, #tpu.memory_space<vmem>>, vector<1x16x256xf32>,
    return
  }
  func.func @transform_0(%arg0: i32) -> (i32, i32, i32) {
    %c0_i32 = arith.constant 0 : i32
    %c0_i32_0 = arith.constant 0 : i32
    %c0_i32_1 = arith.constant 0 : i32
    return %arg0, %c0_i32, %c0_i32_0 : i32, i32, i32
  }
  func.func @transform_1(%arg0: i32) -> (i32, i32) {
    %c0_i32 = arith.constant 0 : i32
    %c0_i32_0 = arith.constant 0 : i32
    %c0_i32_1 = arith.constant 0 : i32
    return %c0_i32, %c0_i32_0 : i32, i32
  }
  func.func @transform_2(%arg0: i32) -> (i32, i32) {
    %c0_i32 = arith.constant 0 : i32
    %c0_i32_0 = arith.constant 0 : i32
    %c0_i32_1 = arith.constant 0 : i32
    return %c0_i32, %c0_i32_0 : i32, i32
  }
  func.func @transform_3(%arg0: i32) -> (i32, i32) {
    %c0_i32 = arith.constant 0 : i32
    %c0_i32_0 = arith.constant 0 : i32
    %c0_i32_1 = arith.constant 0 : i32
    return %c0_i32, %c0_i32_0 : i32, i32
  }
  func.func @transform_4(%arg0: i32) -> (i32, i32) {
    %c0_i32 = arith.constant 0 : i32
    %c0_i32_0 = arith.constant 0 : i32
    %c0_i32_1 = arith.constant 0 : i32
    return %c0_i32, %c0_i32_0 : i32, i32
  }
  func.func @transform_5(%arg0: i32) -> (i32, i32) {
    %c0_i32 = arith.constant 0 : i32
    %c0_i32_0 = arith.constant 0 : i32
    %c0_i32_1 = arith.constant 0 : i32
    return %c0_i32, %c0_i32_0 : i32, i32
  }
  func.func @transform_6(%arg0: i32) -> (i32, i32) {
    %c0_i32 = arith.constant 0 : i32
    %c0_i32_0 = arith.constant 0 : i32
    %c0_i32_1 = arith.constant 0 : i32
    return %c0_i32, %c0_i32_0 : i32, i32
  }
  func.func @transform_7(%arg0: i32) -> (i32, i32) {
    %c0_i32 = arith.constant 0 : i32
    %c0_i32_0 = arith.constant 0 : i32
    %c0_i32_1 = arith.constant 0 : i32
    return %c0_i32, %c0_i32_0 : i32, i32
  }
  func.func @transform_8(%arg0: i32) -> (i32, i32) {
    %c0_i32 = arith.constant 0 : i32
    %c0_i32_0 = arith.constant 0 : i32
    %c0_i32_1 = arith.constant 0 : i32
    return %c0_i32, %c0_i32_0 : i32, i32
  }
  func.func @transform_9(%arg0: i32) -> (i32, i32) {
    %c0_i32 = arith.constant 0 : i32
    %c0_i32_0 = arith.constant 0 : i32
    %c0_i32_1 = arith.constant 0 : i32
    return %c0_i32, %c0_i32_0 : i32, i32
  }
  func.func @transform_10(%arg0: i32) -> (i32, i32) {
    %c0_i32 = arith.constant 0 : i32
    %c0_i32_0 = arith.constant 0 : i32
    %c0_i32_1 = arith.constant 0 : i32
    return %c0_i32, %c0_i32_0 : i32, i32
  }
  func.func @transform_11(%arg0: i32) -> (i32, i32) {
    %c0_i32 = arith.constant 0 : i32
    %c0_i32_0 = arith.constant 0 : i32
    %c0_i32_1 = arith.constant 0 : i32
    return %c0_i32, %c0_i32_0 : i32, i32
  }
  func.func @transform_12(%arg0: i32) -> (i32, i32) {
    %c0_i32 = arith.constant 0 : i32
    %c0_i32_0 = arith.constant 0 : i32
    %c0_i32_1 = arith.constant 0 : i32
    return %c0_i32, %c0_i32_0 : i32, i32
  }
  func.func @transform_13(%arg0: i32) -> (i32, i32) {
    %c0_i32 = arith.constant 0 : i32
    %c0_i32_0 = arith.constant 0 : i32
    %c0_i32_1 = arith.constant 0 : i32
    return %c0_i32, %c0_i32_0 : i32, i32
  }
  func.func @transform_14(%arg0: i32) -> (i32, i32, i32) {
    %c0_i32 = arith.constant 0 : i32
    %c0_i32_0 = arith.constant 0 : i32
    %c0_i32_1 = arith.constant 0 : i32
    return %arg0, %c0_i32, %c0_i32_0 : i32, i32, i32
  }
  func.func @transform_15(%arg0: i32) -> (i32, i32, i32) {
    %c0_i32 = arith.constant 0 : i32
    %c0_i32_0 = arith.constant 0 : i32
    %c0_i32_1 = arith.constant 0 : i32
    return %arg0, %c0_i32, %c0_i32_0 : i32, i32, i32
  }
}

</mosaic_0001>

<bundles_post_ra>
// kernel: tpu_custom_call.1
= control target key start
LH: loop header
LB: loop body
LE: loop exit
PB: predicated region body
PF: predicated region fallthrough
CT: control target
= control target key end

     0   :  { %s4828_s0 = inlined_call_operand.vmem [shape: f32[2,256,16], index: 0, kind: input, shape index: {}]   ;;  %s4829_s1 = inlined_call_operand.vmem [shape: f32[16,64], index: 1, kind: input, shape index: {}]   ;;  %s4830_s2 = inlined_call_operand.vmem [shape: f32[1,64], index: 2, kind: input, shape index: {}]   ;;  %s4831_s3 = inlined_call_operand.vmem [shape: f32[1,64], index: 3, kind: input, shape index: {}]   ;;  %s4832_s4 = inlined_call_operand.vmem [shape: f32[9,64], index: 4, kind: input, shape index: {}]   ;;  %s4833_s5 = inlined_call_operand.vmem [shape: f32[1,64], index: 5, kind: input, shape index: {}]   ;;  %s4834_s6 = inlined_call_operand.vmem [shape: f32[1,64], index: 6, kind: input, shape index: {}]   ;;  %s4835_s7 = inlined_call_operand.vmem [shape: f32[64,16], index: 7, kind: input, shape index: {}]   ;;  %s4836_s8 = inlined_call_operand.vmem [shape: f32[1,16], index: 8, kind: input, shape index: {}]   ;;  %s4837_s9 = inlined_call_operand.vmem [shape: f32[16,64], index: 9, kind: input, shape index: {}]   ;;  %s4838_s10 = inlined_call_operand.vmem [shape: f32[1,64], index: 10, kind: input, shape index: {}]   ;;  %s4839_s11 = inlined_call_operand.vmem [shape: f32[16,64], index: 11, kind: input, shape index: {}]   ;;  %s4840_s12 = inlined_call_operand.vmem [shape: f32[16,1], index: 12, kind: input, shape index: {}]   ;;  %s4841_s13 = inlined_call_operand.vmem [shape: f32[16,1], index: 13, kind: input, shape index: {}]   ;;  %s4842_s14 = inlined_call_operand.vmem [shape: f32[2,16,256], index: 14, kind: input, shape index: {}]   ;;  %s4843_s15 = inlined_call_operand.hbm [shape: f32[2,16,256], index: 15, kind: output, shape index: {}]  }
   0x1   :  { %4872 = sst [smem:[#allocation41_spill]] %s4828_s0 }
   0x2   :  { %4873 = sst [smem:[#allocation42_spill]] %s4829_s1 }
   0x3   :  { %4874 = sst [smem:[#allocation43_spill]] %s4830_s2 }
   0x4   :  { %20 = vsyncpa [#allocation4], 0 }
   0x5   :  { %22 = vsyncpa [#allocation4 + $0x1], 0  ;;  %s3279_s18 = smov 0   ;;  %s3281_s19 = smov 0  }
   0x6   :  { %s3283_s20 = smov 0   ;;  %s3285_s21 = smov 0  }
   0x7 LB: > { %4875 = sst [smem:[#allocation6_spill]] %s3186_s20  ;;  %s3300_s22 = sadd.s32 4294967295, %s3190_s21   ;;  %s3190_s21 = sphi %s3285_s21, %s4962_s21   ;;  %s3186_s20 = sphi %s3283_s20, %s4959_s20   ;;  %s3182_s19 = sphi %s3281_s19, %s4961_s19   ;;  %s3178_s18 = sphi %s3279_s18, %s4960_s18  }
   0x8   : > { %s2759_s23 = sadd.s32 4294967294, %s3190_s21   ;;  %s3304_s24 = sadd.s32 1, %s3190_s21  }
   0x9   : > { %s360_s25 = sadd.s32 1, %s3186_s20  ;;  %s357_s26 = ssub.s32 %s3190_s21, %s3304_s24 }
   0xa   : > { %p370_p0 = scmp.ne.s32.totalorder %s3186_s20, %s3182_s19  ;;  %p358_p1 = scmp.eq.s32.totalorder %s357_s26, 0 }
   0xb   : > { %p371_p2 = scmp.eq.s32.totalorder %s3300_s22, 1  ;;  %p376_p3 = scmp.ne.s32.totalorder %s3182_s19, %s3178_s18 }
   0xc   : > { %p377_p4 = scmp.eq.s32.totalorder %s2759_s23, 1  ;;  %p2762_p7 = scmp.ge.s32.totalorder %s3190_s21, 1 }
   0xd   : > { %s3315_s27 = scalar_select %p358_p1, %s3186_s20, %s360_s25  }
   0xe   : > { %p3317_p5 = por %p371_p2, %p370_p0  ;;  %p3321_p6 = por %p377_p4, %p376_p3 }
   0xf   : > { %4876 = sst [smem:[#allocation7_spill]] %s3315_s27  ;;  %p450_p8 = scmp.lt.s32.totalorder %s3190_s21, 3 }
  0x11   : > { %p451_p9 = pnand %p2762_p7, %p450_p8 }
  0x13   : > { %454 = sbr.rel (%p451_p9) target bundleno = 1259 (0x4eb), region = 80 }
  0x1a   : > { %s4879_s1 = sld [smem:[#allocation42_spill]]  ;;  %p503_p10 = scmp.lt.s32.totalorder %s3300_s22, 1  ;;  %vm547_vm0 = vcmask 130048   ;;  %vm1107_vm1 = vcmask 523264   ;;  %vm1110_vm2 = vcmask 517120   ;;  %v4846_v35 = vmov 0.0  }
  0x1b   : > { %s4880_s0 = sld [smem:[#allocation41_spill]]  ;;  %1113 = vst.msk [vmem:[#allocation2 + $0x20] sm:$0xff] %vm1107_vm1, %v4846_v35  ;;  %1108 = vst.msk [vmem:[#allocation2] sm:$0xff] %vm1107_vm1, %v4846_v35  ;;  %s4881_s2 = sld [smem:[#allocation43_spill]]  ;;  %v3523_v38 = vld [vmem:[%s4831_s3] ss:$0 sm:$0xff]  ;;  %v1230_v52 = vlaneseq }
  0x1c   : > { %s3335_s25 = scalar_select %p503_p10, %s3300_s22, 1  ;;  %1114 = vst.msk [vmem:[#allocation2 + $0x28] sm:$0x3] %vm1110_vm2, %v4846_v35  ;;  %1111 = vst.msk [vmem:[#allocation2 + $0x10] sm:$0x3] %vm1110_vm2, %v4846_v35  ;;  %vm3194_vm3 = vmmov 0  }
  0x1d   : > { %1109 = vst.msk [vmem:[#allocation2 + $0x8] sm:$0xff] %vm1107_vm1, %v4846_v35  ;;  %1112 = vst.msk [vmem:[#allocation2 + $0x18] sm:$0xff] %vm1107_vm1, %v4846_v35 }
  0x1e   : > { %s2846_s26 = sshll.u32 %s3335_s25, 8  ;;  %1115 = vst.msk [vmem:[#allocation2 + $0x30] sm:$0xff] %vm1107_vm1, %v4846_v35  ;;  %1116 = vst.msk [vmem:[#allocation2 + $0x38] sm:$0xff] %vm1107_vm1, %v4846_v35  ;;  %s2847_s20 = sshll.u32 %s3335_s25, 5 }
  0x1f   : > { %1117 = vst.msk [vmem:[#allocation2 + $0x40] sm:$0x3] %vm1110_vm2, %v4846_v35  ;;  %1120 = vst.msk [vmem:[#allocation2 + $0x58] sm:$0x3] %vm1110_vm2, %v4846_v35  ;;  %s512_s17 = scalar_lea.vmem %s4842_s14, %s2847_s20 }
  0x20   : > { %v545_v0 = vld [vmem:[%s4879_s1] sm:$0xff]  ;;  %v546_v1 = vld [vmem:[%s4879_s1 + $0x8] sm:$0xff]  ;;  %1118 = vst.msk [vmem:[#allocation2 + $0x48] sm:$0xff] %vm1107_vm1, %v4846_v35  ;;  %1119 = vst.msk [vmem:[#allocation2 + $0x50] sm:$0xff] %vm1107_vm1, %v4846_v35 }
  0x21   : > { %v3009_v2 = vpack.c.bf16 %v546_v1, %v545_v0  ;;  %s3341_s30 = scalar_lea.vmem %s4880_s0, %s2846_s26  ;;  %1121 = vst.msk [vmem:[#allocation2 + $0x60] sm:$0xff] %vm1107_vm1, %v4846_v35  ;;  %1122 = vst.msk [vmem:[#allocation2 + $0x68] sm:$0xff] %vm1107_vm1, %v4846_v35  ;;  %v3518_v36 = vld [vmem:[%s4881_s2] ss:$0 sm:$0xff]  ;;  %s500_s0 = sand.u32 1, %s3182_s19  }
  0x22   : > { %v513_v3 = vld [vmem:[%s3341_s30] sm:$0xff]  ;;  %v514_v4 = vld [vmem:[%s3341_s30 + $0x8] sm:$0xff]  ;;  %v515_v5 = vld [vmem:[%s3341_s30 + $0x10] sm:$0xff]  ;;  %1123 = vst.msk [vmem:[#allocation2 + $0x70] sm:$0x3] %vm1110_vm2, %v4846_v35  ;;  %s2763_s23 = sshll.u32 %s500_s0, 5 }
  0x23   : > { %3010 = vmatprep.subr.bf16.mxu0 %v3009_v2  ;;  %2935 = vmatprep.mubr.msk.f32.mxu0 %vm547_vm0, %v513_v3  ;;  %v516_v6 = vld [vmem:[%s3341_s30 + $0x18] sm:$0xff]  ;;  %v517_v7 = vld [vmem:[%s3341_s30 + $0x20] sm:$0xff]  ;;  %v518_v8 = vld [vmem:[%s3341_s30 + $0x28] sm:$0xff]  ;;  %1124 = vst.msk [vmem:[#allocation2 + $0x78] sm:$0xff] %vm1107_vm1, %v4846_v35  ;;  %s502_s25 = scalar_lea.vmem [#allocation3], %s2763_s23  ;;  %s4787_s23 = scalar_lea.sflag [#allocation4], %s500_s0 }
  0x24   : > { %3012 = vmatpush3.bf16.msra.mxu0 %v3009_v2  ;;  %v519_v9 = vld [vmem:[%s3341_s30 + $0x30] sm:$0xff]  ;;  %v520_v10 = vld [vmem:[%s3341_s30 + $0x38] sm:$0xff]  ;;  %v521_v11 = vld [vmem:[%s3341_s30 + $0x40] sm:$0xff]  ;;  %1125 = vst.msk [vmem:[#allocation2 + $0x80] sm:$0xff] %vm1107_vm1, %v4846_v35  ;;  %v3536_v2 = vshrl.u32 %v1230_v52, 7  ;;  %s2685_s26 = sshll.u32 %s502_s25, 4  ;;  %s4778_s26 = int_to_ptr.vmem [resolvable:$true] %s2685_s26 }
  0x25   : > { %v522_v12 = vld [vmem:[%s3341_s30 + $0x48] sm:$0xff]  ;;  %v523_v13 = vld [vmem:[%s3341_s30 + $0x50] sm:$0xff]  ;;  %v524_v14 = vld [vmem:[%s3341_s30 + $0x58] sm:$0xff]  ;;  %1126 = vst.msk [vmem:[#allocation2 + $0x88] sm:$0x3] %vm1110_vm2, %v4846_v35 }
  0x26   : > { %v525_v15 = vld [vmem:[%s3341_s30 + $0x60] sm:$0xff]  ;;  %v526_v16 = vld [vmem:[%s3341_s30 + $0x68] sm:$0xff]  ;;  %v527_v17 = vld [vmem:[%s3341_s30 + $0x70] sm:$0xff]  ;;  %1127 = vst.msk [vmem:[#allocation2 + $0x90] sm:$0xff] %vm1107_vm1, %v4846_v35 }
  0x27   : > { %2936 = vmatmul.mubr.msk.f32.vlgmr.msra.gmra.mrb[0].mxu0 %vm547_vm0, %v514_v4  ;;  %v528_v18 = vld [vmem:[%s3341_s30 + $0x78] sm:$0xff]  ;;  %v529_v19 = vld [vmem:[%s3341_s30 + $0x80] sm:$0xff]  ;;  %v530_v20 = vld [vmem:[%s3341_s30 + $0x88] sm:$0xff]  ;;  %1128 = vst.msk [vmem:[#allocation2 + $0x98] sm:$0xff] %vm1107_vm1, %v4846_v35 }
  0x28   : > { %2938 = vmatprep.mubr.msk.f32.mxu0 %vm547_vm0, %v515_v5  ;;  %v531_v21 = vld [vmem:[%s3341_s30 + $0x90] sm:$0xff]  ;;  %v532_v22 = vld [vmem:[%s3341_s30 + $0x98] sm:$0xff]  ;;  %v533_v23 = vld [vmem:[%s3341_s30 + $0xa0] sm:$0xff]  ;;  %1129 = vst.msk [vmem:[#allocation2 + $0xa0] sm:$0x3] %vm1110_vm2, %v4846_v35 }
  0x29   : > { %v534_v24 = vld [vmem:[%s3341_s30 + $0xa8] sm:$0xff]  ;;  %v535_v25 = vld [vmem:[%s3341_s30 + $0xb0] sm:$0xff]  ;;  %v536_v26 = vld [vmem:[%s3341_s30 + $0xb8] sm:$0xff]  ;;  %1130 = vst.msk [vmem:[#allocation2 + $0xa8] sm:$0xff] %vm1107_vm1, %v4846_v35 }
  0x2a   : > { %v537_v27 = vld [vmem:[%s3341_s30 + $0xc0] sm:$0xff]  ;;  %v538_v28 = vld [vmem:[%s3341_s30 + $0xc8] sm:$0xff]  ;;  %v539_v29 = vld [vmem:[%s3341_s30 + $0xd0] sm:$0xff]  ;;  %1131 = vst.msk [vmem:[#allocation2 + $0xb0] sm:$0xff] %vm1107_vm1, %v4846_v35 }
  0x2b   : > { %2939 = vmatmul.mubr.msk.f32.gmra.mrb[2].mxu0 %vm547_vm0, %v516_v6  ;;  %v540_v30 = vld [vmem:[%s3341_s30 + $0xd8] sm:$0xff]  ;;  %v541_v31 = vld [vmem:[%s3341_s30 + $0xe0] sm:$0xff]  ;;  %v542_v32 = vld [vmem:[%s3341_s30 + $0xe8] sm:$0xff]  ;;  %1132 = vst.msk [vmem:[#allocation2 + $0xb8] sm:$0x3] %vm1110_vm2, %v4846_v35 }
  0x2c   : > { %2941 = vmatprep.mubr.msk.f32.mxu0 %vm547_vm0, %v517_v7  ;;  %v543_v33 = vld [vmem:[%s3341_s30 + $0xf0] sm:$0xff]  ;;  %v544_v34 = vld [vmem:[%s3341_s30 + $0xf8] sm:$0xff]  ;;  %1133 = vst.msk [vmem:[#allocation2 + $0xc0] sm:$0xff] %vm1107_vm1, %v4846_v35  ;;  %1134 = vst.msk [vmem:[#allocation2 + $0xc8] sm:$0xff] %vm1107_vm1, %v4846_v35  ;;  %s2848_s30 = sshll.u32 %s3300_s22, 9  ;;  %s3128_s22 = scalar_lea.vmem %s4778_s26, 512 }
  0x2d   : > { %1135 = vst.msk [vmem:[#allocation2 + $0xd0] sm:$0x3] %vm1110_vm2, %v4846_v35  ;;  %1138 = vst.msk [vmem:[#allocation2 + $0xe8] sm:$0x3] %vm1110_vm2, %v4846_v35  ;;  %s4783_s16 = scalar_lea.hbm %s4843_s15, %s2848_s30  ;;  %p3129_p11 = scmp.ne.s32.totalorder %s4778_s26, %s3128_s22 }
  0x2e   : > { %1136 = vst.msk [vmem:[#allocation2 + $0xd8] sm:$0xff] %vm1107_vm1, %v4846_v35  ;;  %1137 = vst.msk [vmem:[#allocation2 + $0xe0] sm:$0xff] %vm1107_vm1, %v4846_v35 }
  0x2f   : > { %2942 = vmatmul.mubr.msk.f32.gmra.mrb[4].mxu0 %vm547_vm0, %v518_v8  ;;  %1139 = vst.msk [vmem:[#allocation2 + $0xf0] sm:$0xff] %vm1107_vm1, %v4846_v35  ;;  %1140 = vst.msk [vmem:[#allocation2 + $0xf8] sm:$0xff] %vm1107_vm1, %v4846_v35  ;;  %p3130_p12 = pnand %p3129_p11, %p3317_p5 }
  0x30   : > { %2944 = vmatprep.mubr.msk.f32.mxu0 %vm547_vm0, %v519_v9  ;;  %1141 = vst.msk [vmem:[#allocation2 + $0x100] sm:$0x3] %vm1110_vm2, %v4846_v35  ;;  %1144 = vst.msk [vmem:[#allocation2 + $0x118] sm:$0x3] %vm1110_vm2, %v4846_v35 }
  0x31   : > { %1142 = vst.msk [vmem:[#allocation2 + $0x108] sm:$0xff] %vm1107_vm1, %v4846_v35  ;;  %1143 = vst.msk [vmem:[#allocation2 + $0x110] sm:$0xff] %vm1107_vm1, %v4846_v35  ;;  %p3131_p13 = pneg %p3130_p12 }
  0x32   : > { %1145 = vst.msk [vmem:[#allocation2 + $0x120] sm:$0xff] %vm1107_vm1, %v4846_v35  ;;  %1146 = vst.msk [vmem:[#allocation2 + $0x128] sm:$0xff] %vm1107_vm1, %v4846_v35 }
  0x33   : > { %2945 = vmatmul.mubr.msk.f32.gmra.mrb[6].mxu0 %vm547_vm0, %v520_v10  ;;  %1147 = vst.msk [vmem:[#allocation2 + $0x130] sm:$0x3] %vm1110_vm2, %v4846_v35  ;;  %1150 = vst.msk [vmem:[#allocation2 + $0x148] sm:$0x3] %vm1110_vm2, %v4846_v35 }
  0x34   : > { %2947 = vmatprep.mubr.msk.f32.mxu0 %vm547_vm0, %v521_v11  ;;  %1148 = vst.msk [vmem:[#allocation2 + $0x138] sm:$0xff] %vm1107_vm1, %v4846_v35  ;;  %1149 = vst.msk [vmem:[#allocation2 + $0x140] sm:$0xff] %vm1107_vm1, %v4846_v35 }
  0x35   : > { %1151 = vst.msk [vmem:[#allocation2 + $0x150] sm:$0xff] %vm1107_vm1, %v4846_v35  ;;  %1152 = vst.msk [vmem:[#allocation2 + $0x158] sm:$0xff] %vm1107_vm1, %v4846_v35 }
  0x36   : > { %1153 = vst.msk [vmem:[#allocation2 + $0x160] sm:$0x3] %vm1110_vm2, %v4846_v35  ;;  %1156 = vst.msk [vmem:[#allocation2 + $0x178] sm:$0x3] %vm1110_vm2, %v4846_v35 }
  0x37   : > { %2948 = vmatmul.mubr.msk.f32.gmra.mrb[8].mxu0 %vm547_vm0, %v522_v12  ;;  %1154 = vst.msk [vmem:[#allocation2 + $0x168] sm:$0xff] %vm1107_vm1, %v4846_v35  ;;  %1155 = vst.msk [vmem:[#allocation2 + $0x170] sm:$0xff] %vm1107_vm1, %v4846_v35 }
  0x38   : > { %2950 = vmatprep.mubr.msk.f32.mxu0 %vm547_vm0, %v523_v13  ;;  %1157 = vst.msk [vmem:[#allocation2 + $0x180] sm:$0xff] %vm1107_vm1, %v4846_v35  ;;  %1158 = vst.msk [vmem:[#allocation2 + $0x188] sm:$0xff] %vm1107_vm1, %v4846_v35 }
  0x39   : > { %1159 = vst.msk [vmem:[#allocation2 + $0x190] sm:$0x3] %vm1110_vm2, %v4846_v35  ;;  %1162 = vst.msk [vmem:[#allocation2 + $0x1a8] sm:$0x3] %vm1110_vm2, %v4846_v35 }
  0x3a   : > { %1160 = vst.msk [vmem:[#allocation2 + $0x198] sm:$0xff] %vm1107_vm1, %v4846_v35  ;;  %1161 = vst.msk [vmem:[#allocation2 + $0x1a0] sm:$0xff] %vm1107_vm1, %v4846_v35 }
  0x3b   : > { %2951 = vmatmul.mubr.msk.f32.gmra.mrb[10].mxu0 %vm547_vm0, %v524_v14  ;;  %4882 = vst [vmem:[#allocation8_spill] sm:$0xff] %v3536_v2  ;;  %vm4671_vm4 = vmpackc.low %vm1107_vm1, %vm1107_vm1 }
  0x3c   : > { %2953 = vmatprep.mubr.msk.f32.mxu0 %vm547_vm0, %v525_v15 }
  0x3f   : > { %2954 = vmatmul.mubr.msk.f32.gmra.mrb[12].mxu0 %vm547_vm0, %v526_v16  ;;  %v1332_v16 = vsub.s32 1, %v3536_v2 }
  0x40   : > { %2956 = vmatprep.mubr.msk.f32.mxu0 %vm547_vm0, %v527_v17  ;;  %v4845_v17 = vsub.s32 0, %v3536_v2 }
  0x43   : > { %2957 = vmatmul.mubr.msk.f32.gmra.mrb[14].mxu0 %vm547_vm0, %v528_v18 }
  0x44   : > { %2959 = vmatprep.mubr.msk.f32.mxu0 %vm547_vm0, %v529_v19 }
  0x47   : > { %2960 = vmatmul.mubr.msk.f32.gmra.mrb[16].mxu0 %vm547_vm0, %v530_v20 }
  0x48   : > { %2962 = vmatprep.mubr.msk.f32.mxu0 %vm547_vm0, %v531_v21  ;;  %v3548_v21 = vld [vmem:[%s4832_s4] sm:$0xff] }
  0x4b   : > { %2963 = vmatmul.mubr.msk.f32.gmra.mrb[18].mxu0 %vm547_vm0, %v532_v22 }
  0x4c   : > { %2965 = vmatprep.mubr.msk.f32.mxu0 %vm547_vm0, %v533_v23 }
  0x4f   : > { %2966 = vmatmul.mubr.msk.f32.gmra.mrb[20].mxu0 %vm547_vm0, %v534_v24 }
  0x50   : > { %2968 = vmatprep.mubr.msk.f32.mxu0 %vm547_vm0, %v535_v25 }
  0x53   : > { %2969 = vmatmul.mubr.msk.f32.gmra.mrb[22].mxu0 %vm547_vm0, %v536_v26 }
  0x54   : > { %2971 = vmatprep.mubr.msk.f32.mxu0 %vm547_vm0, %v537_v27 }
  0x57   : > { %2972 = vmatmul.mubr.msk.f32.gmra.mrb[24].mxu0 %vm547_vm0, %v538_v28  ;;  %v3552_v28 = vrot.slane %v3548_v21, %v1332_v16 }
  0x58   : > { %2974 = vmatprep.mubr.msk.f32.mxu0 %vm547_vm0, %v539_v29  ;;  %v1432_v29 = vsub.s32 2, %v3536_v2 }
  0x5b   : > { %2975 = vmatmul.mubr.msk.f32.gmra.mrb[26].mxu0 %vm547_vm0, %v540_v30  ;;  %v3558_v30 = vrot.slane %v3548_v21, %v4845_v17 }
  0x5c   : > { %2977 = vmatprep.mubr.msk.f32.mxu0 %vm547_vm0, %v541_v31 }
  0x5f   : > { %2978 = vmatmul.mubr.msk.f32.gmra.mrb[28].mxu0 %vm547_vm0, %v542_v32 }
  0x60   : > { %2980 = vmatprep.mubr.msk.f32.mxu0 %vm547_vm0, %v543_v33  ;;  %v1198_v33 = vld [vmem:[#allocation2] sm:$0xff] }
  0x63   : > { %2981 = vmatmul.mubr.msk.f32.gmra.mrb[30].mxu0 %vm547_vm0, %v544_v34  ;;  %v1298_v34 = vld [vmem:[#allocation2 + $0x1] sm:$0xff] }
  0xfa   : > { %v2937_v37 = vpop.f32.mrb[0].mxu0 }
  0xfb   : > { %v877_v39 = vmul.f32 %v2937_v37, %v3518_v36  ;;  %v710_v40 = vpop.f32.mrb[1].mxu0 }
  0xfc   : > { %v876_v41 = vmul.f32 %v3518_v36, %v710_v40 }
  0xfd   : > { %v916_v42 = vadd.f32 %v3523_v38, %v877_v39 }
  0xfe   : > { %v915_v43 = vadd.f32 %v3523_v38, %v876_v41  ;;  %v2940_v44 = vpop.f32.mrb[2].mxu0 }
  0xff   : > { %v948_v45 = vadd.f32 3.0, %v916_v42  ;;  %v879_v46 = vmul.f32 %v2940_v44, %v3518_v36  ;;  %v720_v47 = vpop.f32.mrb[3].mxu0  ;;  %v3568_v44 = vrot.slane %v3548_v21, %v1432_v29 }
 0x100   : > { %v947_v48 = vadd.f32 3.0, %v915_v43  ;;  %v878_v49 = vmul.f32 %v3518_v36, %v720_v47  ;;  %v1532_v47 = vsub.s32 3, %v3536_v2 }
 0x101   : > { %v980_v50 = vmax.f32 %v948_v45, 0.0  ;;  %v918_v51 = vadd.f32 %v3523_v38, %v879_v46  ;;  %v1234_v45 = vmul.f32 %v3558_v30, %v1198_v33  ;;  %v1334_v46 = vmul.f32 %v3552_v28, %v1298_v34 }
 0x102   : > { %v979_v53 = vmax.f32 %v947_v48, 0.0  ;;  %v917_v54 = vadd.f32 %v3523_v38, %v878_v49  ;;  %v2943_v55 = vpop.f32.mrb[4].mxu0  ;;  %v1398_v49 = vld [vmem:[#allocation2 + $0x2] sm:$0xff] }
 0x103   : > { %v1012_v56 = vmin.f32 %v980_v50, 6.0  ;;  %v950_v57 = vadd.f32 3.0, %v918_v51  ;;  %v881_v58 = vmul.f32 %v2943_v55, %v3518_v36  ;;  %v730_v59 = vpop.f32.mrb[5].mxu0  ;;  %v1399_v55 = vld [vmem:[#allocation2 + $0xa] sm:$0xff] }
 0x104   : > { %v1011_v60 = vmin.f32 %v979_v53, 6.0  ;;  %v949_v61 = vadd.f32 3.0, %v917_v54  ;;  %v880_v62 = vmul.f32 %v3518_v36, %v730_v59  ;;  %v1434_v59 = vmul.f32 %v3568_v44, %v1398_v49 }
 0x105   : > { %v1044_v63 = vmul.f32 %v1012_v56, %v916_v42  ;;  %v982_v0 = vmax.f32 %v950_v57, 0.0  ;;  %v920_v1 = vadd.f32 %v3523_v38, %v881_v58  ;;  %v1199_v42 = vld [vmem:[#allocation2 + $0x8] sm:$0xff]  ;;  %v1366_v58 = vadd.f32 %v1334_v46, %v1234_v45 }
 0x106   : > { %v1043_v3 = vmul.f32 %v1011_v60, %v915_v43  ;;  %v981_v4 = vmax.f32 %v949_v61, 0.0  ;;  %v919_v5 = vadd.f32 %v3523_v38, %v880_v62  ;;  %v2946_v6 = vpop.f32.mrb[6].mxu0  ;;  %v1299_v43 = vld [vmem:[#allocation2 + $0x9] sm:$0xff]  ;;  %v1235_v52 = vmul.f32 %v3558_v30, %v1199_v42 }
 0x107   : > { %v1076_v7 = vmul.f32 0.16666667, %v1044_v63  ;;  %v1014_v8 = vmin.f32 %v982_v0, 6.0  ;;  %v952_v9 = vadd.f32 3.0, %v920_v1  ;;  %v740_v10 = vpop.f32.mrb[7].mxu0  ;;  %v883_v39 = vmul.f32 %v2946_v6, %v3518_v36 }
 0x108   : > { %v1075_v11 = vmul.f32 0.16666667, %v1043_v3  ;;  %v1013_v12 = vmin.f32 %v981_v4, 6.0  ;;  %v951_v13 = vadd.f32 3.0, %v919_v5  ;;  %v1335_v53 = vmul.f32 %v3552_v28, %v1299_v43 }
 0x109   : > { %1165 = vst.msk [vmem:[#allocation2 + $0x21] sm:$0xff] %vm1107_vm1, %v1076_v7  ;;  %v1046_v14 = vmul.f32 %v1014_v8, %v918_v51  ;;  %v984_v15 = vmax.f32 %v952_v9, 0.0  ;;  %v922_v50 = vadd.f32 %v3523_v38, %v883_v39  ;;  %v3584_v60 = vrot.slane %v3548_v21, %v1532_v47 }
 0x10a   : > { %1164 = vst.msk [vmem:[#allocation2 + $0x19] sm:$0xff] %vm1107_vm1, %v1075_v11  ;;  %v1045_v18 = vmul.f32 %v1013_v12, %v917_v54  ;;  %v983_v19 = vmax.f32 %v951_v13, 0.0  ;;  %v3543_v20 = vpop.f32.mrb[8].mxu0  ;;  %v882_v54 = vmul.f32 %v3518_v36, %v740_v10  ;;  %v1632_v0 = vsub.s32 4, %v3536_v2 }
 0x10b   : > { %v1078_v22 = vmul.f32 0.16666667, %v1046_v14  ;;  %v1016_v23 = vmin.f32 %v984_v15, 6.0  ;;  %v750_v24 = vpop.f32.mrb[9].mxu0  ;;  %v954_v62 = vadd.f32 3.0, %v922_v50  ;;  %v1435_v3 = vmul.f32 %v3568_v44, %v1399_v55 }
 0x10c   : > { %v1077_v25 = vmul.f32 0.16666667, %v1045_v18  ;;  %v1015_v26 = vmin.f32 %v983_v19, 6.0  ;;  %v3593_v4 = vadd.f32 %v3523_v38, %v882_v54  ;;  %v1732_v8 = vsub.s32 5, %v3536_v2 }
 0x10d   : > { %1167 = vst.msk [vmem:[#allocation2 + $0x39] sm:$0xff] %vm1107_vm1, %v1078_v22  ;;  %v1048_v27 = vmul.f32 %v1016_v23, %v920_v1  ;;  %v1367_v1 = vadd.f32 %v1335_v53, %v1235_v52  ;;  %v1466_v9 = vadd.f32 %v1434_v59, %v1366_v58  ;;  %v986_v12 = vmax.f32 %v954_v62, 0.0 }
 0x10e   : > { %1166 = vst.msk [vmem:[#allocation2 + $0x31] sm:$0xff] %vm1107_vm1, %v1077_v25  ;;  %v1047_v31 = vmul.f32 %v1015_v26, %v919_v5  ;;  %v3561_v32 = vpop.f32.mrb[10].mxu0  ;;  %v3604_v15 = vrot.slane %v3548_v21, %v1632_v0  ;;  %v953_v22 = vadd.f32 3.0, %v3593_v4  ;;  %v885_v25 = vmul.f32 %v3543_v20, %v3518_v36 }
 0x10f   : > { %v1080_v37 = vmul.f32 0.16666667, %v1048_v27  ;;  %v3564_v40 = vpop.f32.mrb[11].mxu0  ;;  %v1467_v18 = vadd.f32 %v1435_v3, %v1367_v1  ;;  %v884_v26 = vmul.f32 %v3518_v36, %v750_v24  ;;  %v3612_v27 = vrot.slane %v3548_v21, %v1732_v8 }
 0x110   : > { %v1079_v41 = vmul.f32 0.16666667, %v1047_v31  ;;  %v1301_v14 = vld [vmem:[#allocation2 + $0x21] sm:$0xff]  ;;  %v1833_v24 = vsub.s32 6, %v3536_v2  ;;  %v985_v45 = vmax.f32 %v953_v22, 0.0  ;;  %v924_v49 = vadd.f32 %v3523_v38, %v885_v25 }
 0x111   : > { %1169 = vst.msk [vmem:[#allocation2 + $0x51] sm:$0xff] %vm1107_vm1, %v1080_v37  ;;  %v1200_v56 = vld [vmem:[#allocation2 + $0x18] sm:$0xff]  ;;  %v1201_v5 = vld [vmem:[#allocation2 + $0x20] sm:$0xff]  ;;  %v1337_v34 = vmul.f32 %v3552_v28, %v1301_v14  ;;  %v923_v52 = vadd.f32 %v3523_v38, %v884_v26  ;;  %v1635_v54 = vmul.f32 %v3604_v15, %v1301_v14  ;;  %v887_v25 = vmul.f32 %v3561_v32, %v3518_v36 }
 0x112   : > { %1168 = vst.msk [vmem:[#allocation2 + $0x49] sm:$0xff] %vm1107_vm1, %v1079_v41  ;;  %v3574_v48 = vpop.f32.mrb[12].mxu0  ;;  %v1300_v57 = vld [vmem:[#allocation2 + $0x19] sm:$0xff]  ;;  %v1236_v6 = vmul.f32 %v3558_v30, %v1200_v56  ;;  %v1534_v10 = vmul.f32 %v3584_v60, %v1200_v56  ;;  %v1535_v19 = vmul.f32 %v3584_v60, %v1201_v5  ;;  %v1237_v37 = vmul.f32 %v3558_v30, %v1201_v5  ;;  %v1401_v53 = vld [vmem:[#allocation2 + $0x22] sm:$0xff] }
 0x113   : > { %v3577_v51 = vpop.f32.mrb[13].mxu0  ;;  %v1336_v7 = vmul.f32 %v3552_v28, %v1300_v57  ;;  %v1400_v16 = vld [vmem:[#allocation2 + $0x1a] sm:$0xff]  ;;  %v1018_v41 = vmin.f32 %v986_v12, 6.0  ;;  %v1634_v20 = vmul.f32 %v3604_v15, %v1300_v57  ;;  %v1933_v56 = vsub.s32 7, %v3536_v2 }
 0x114   : > { %v1566_v29 = vadd.f32 %v1534_v10, %v1466_v9  ;;  %v1436_v39 = vmul.f32 %v3568_v44, %v1400_v16  ;;  %v1567_v43 = vadd.f32 %v1535_v19, %v1467_v18  ;;  %v1369_v59 = vadd.f32 %v1337_v34, %v1237_v37 }
 0x115   : > { %v1368_v23 = vadd.f32 %v1336_v7, %v1236_v6  ;;  %v1202_v31 = vld [vmem:[#allocation2 + $0x30] sm:$0xff]  ;;  %v1050_v57 = vmul.f32 %v1018_v41, %v922_v50  ;;  %v1734_v1 = vmul.f32 %v3612_v27, %v1400_v16  ;;  %v3634_v5 = vrot.slane %v3548_v21, %v1833_v24  ;;  %v1203_v8 = vld [vmem:[#allocation2 + $0x38] sm:$0xff] }
 0x116   : > { %v3586_v61 = vpop.f32.mrb[14].mxu0  ;;  %v1536_v47 = vmul.f32 %v3584_v60, %v1202_v31  ;;  %v1666_v55 = vadd.f32 %v1634_v20, %v1566_v29  ;;  %v1667_v0 = vadd.f32 %v1635_v54, %v1567_v43  ;;  %v1302_v3 = vld [vmem:[#allocation2 + $0x31] sm:$0xff]  ;;  %v1017_v6 = vmin.f32 %v985_v45, 6.0  ;;  %v1303_v41 = vld [vmem:[#allocation2 + $0x39] sm:$0xff] }
 0x117   : > { %v3588_v63 = vpop.f32.mrb[15].mxu0  ;;  %v1468_v46 = vadd.f32 %v1436_v39, %v1368_v23  ;;  %v1437_v7 = vmul.f32 %v3568_v44, %v1401_v53  ;;  %v956_v10 = vadd.f32 3.0, %v924_v49  ;;  %v955_v12 = vadd.f32 3.0, %v923_v52  ;;  %v1402_v29 = vld [vmem:[#allocation2 + $0x32] sm:$0xff] }
 0x118   : > { %v1735_v14 = vmul.f32 %v3612_v27, %v1401_v53  ;;  %v1766_v18 = vadd.f32 %v1734_v1, %v1666_v55  ;;  %v3639_v50 = vrot.slane %v3548_v21, %v1933_v56  ;;  %v1636_v22 = vmul.f32 %v3604_v15, %v1302_v3 }
 0x119   : > { %v1568_v9 = vadd.f32 %v1536_v47, %v1468_v46  ;;  %v1469_v16 = vadd.f32 %v1437_v7, %v1369_v59  ;;  %v1082_v23 = vmul.f32 0.16666667, %v1050_v57  ;;  %v1537_v34 = vmul.f32 %v3584_v60, %v1203_v8  ;;  %v1204_v7 = vld [vmem:[#allocation2 + $0x48] sm:$0xff] }
 0x11a   : > { %v3599_v11 = vpop.f32.mrb[16].mxu0  ;;  %v1767_v37 = vadd.f32 %v1735_v14, %v1667_v0  ;;  %v1835_v39 = vmul.f32 %v3634_v5, %v1202_v31  ;;  %v1049_v21 = vmul.f32 %v1017_v6, %v3593_v4  ;;  %v1238_v43 = vmul.f32 %v3558_v30, %v1202_v31 }
 0x11b   : > { %v3601_v13 = vpop.f32.mrb[17].mxu0  ;;  %v1668_v20 = vadd.f32 %v1636_v22, %v1568_v9  ;;  %1171 = vst.msk [vmem:[#allocation2 + $0x69] sm:$0xff] %vm1107_vm1, %v1082_v23  ;;  %v988_v24 = vmax.f32 %v956_v10, 0.0  ;;  %v987_v45 = vmax.f32 %v955_v12, 0.0  ;;  %v1338_v32 = vmul.f32 %v3552_v28, %v1302_v3 }
 0x11c   : > { %v1836_v46 = vmul.f32 %v3634_v5, %v1203_v8  ;;  %v1867_v47 = vadd.f32 %v1835_v39, %v1766_v18  ;;  %v1081_v53 = vmul.f32 0.16666667, %v1049_v21  ;;  %v1736_v55 = vmul.f32 %v3612_v27, %v1402_v29 }
 0x11d   : > { %v1020_v56 = vmin.f32 %v988_v24, 6.0  ;;  %v1019_v4 = vmin.f32 %v987_v45, 6.0  ;;  %v886_v31 = vmul.f32 %v3518_v36, %v3564_v40  ;;  %v1339_v57 = vmul.f32 %v3552_v28, %v1303_v41  ;;  %v3669_v40 = vld [vmem:[%s4832_s4 + $0x8] ss:$0 sm:$0xff]  ;;  %v1304_v45 = vld [vmem:[#allocation2 + $0x49] sm:$0xff] }
 0x11e   : > { %v3614_v33 = vpop.f32.mrb[18].mxu0  ;;  %v1569_v0 = vadd.f32 %v1537_v34, %v1469_v16  ;;  %v1868_v1 = vadd.f32 %v1836_v46, %v1767_v37  ;;  %v1935_v6 = vmul.f32 %v3639_v50, %v1302_v3  ;;  %1170 = vst.msk [vmem:[#allocation2 + $0x61] sm:$0xff] %vm1107_vm1, %v1081_v53  ;;  %v1637_v9 = vmul.f32 %v3604_v15, %v1303_v41  ;;  %v1403_v34 = vld [vmem:[#allocation2 + $0x3a] sm:$0xff] }
 0x11f   : > { %v3619_v42 = vpop.f32.mrb[19].mxu0  ;;  %v1768_v10 = vadd.f32 %v1736_v55, %v1668_v20  ;;  %v1052_v12 = vmul.f32 %v1020_v56, %v924_v49  ;;  %v1051_v14 = vmul.f32 %v1019_v4, %v923_v52  ;;  %v1936_v18 = vmul.f32 %v3639_v50, %v1303_v41  ;;  %v1205_v4 = vld [vmem:[#allocation2 + $0x50] sm:$0xff] }
 0x120   : > { %v1239_v16 = vmul.f32 %v3558_v30, %v1203_v8  ;;  %v1370_v22 = vadd.f32 %v1338_v32, %v1238_v43  ;;  %v1967_v23 = vadd.f32 %v1935_v6, %v1867_v47  ;;  %v1837_v37 = vmul.f32 %v3634_v5, %v1204_v7 }
 0x121   : > { %v1084_v39 = vmul.f32 0.16666667, %v1052_v12  ;;  %v1083_v21 = vmul.f32 0.16666667, %v1051_v14  ;;  %v3677_v49 = vadd.f32 %v3523_v38, %v887_v25  ;;  %v1438_v20 = vmul.f32 %v3568_v44, %v1402_v29 }
 0x122   : > { %v3628_v58 = vpop.f32.mrb[20].mxu0  ;;  %v1669_v24 = vadd.f32 %v1637_v9, %v1569_v0  ;;  %v1968_v41 = vadd.f32 %v1936_v18, %v1868_v1  ;;  %v3683_v8 = vadd.f32 %v3523_v38, %v886_v31  ;;  %v2035_v43 = vmul.f32 %v3669_v40, %v1402_v29  ;;  %v1305_v18 = vld [vmem:[#allocation2 + $0x51] sm:$0xff] }
 0x123   : > { %v3630_v62 = vpop.f32.mrb[21].mxu0  ;;  %v1869_v32 = vadd.f32 %v1837_v37, %v1768_v10  ;;  %1173 = vst.msk [vmem:[#allocation2 + $0x81] sm:$0xff] %vm1107_vm1, %v1084_v39  ;;  %1172 = vst.msk [vmem:[#allocation2 + $0x79] sm:$0xff] %vm1107_vm1, %v1083_v21  ;;  %v1737_v25 = vmul.f32 %v3612_v27, %v1403_v34  ;;  %v2036_v46 = vmul.f32 %v3669_v40, %v1403_v34  ;;  %v958_v29 = vadd.f32 3.0, %v3677_v49  ;;  %v1404_v10 = vld [vmem:[#allocation2 + $0x4a] sm:$0xff] }
 0x124   : > { %v1371_v47 = vadd.f32 %v1339_v57, %v1239_v16  ;;  %v1470_v53 = vadd.f32 %v1438_v20, %v1370_v22  ;;  %v2067_v56 = vadd.f32 %v2035_v43, %v1967_v23  ;;  %v1538_v31 = vmul.f32 %v3584_v60, %v1204_v7  ;;  %v3701_v57 = vld [vmem:[%s4833_s5] ss:$0 sm:$0xff] }
 0x125   : > { %v1937_v0 = vmul.f32 %v3639_v50, %v1304_v45  ;;  %v1439_v6 = vmul.f32 %v3568_v44, %v1403_v34  ;;  %v2068_v9 = vadd.f32 %v2036_v46, %v1968_v41  ;;  %v1769_v12 = vadd.f32 %v1737_v25, %v1669_v24 }
 0x126   : > { %v3641_v19 = vpop.f32.mrb[22].mxu0  ;;  %v957_v14 = vadd.f32 3.0, %v3683_v8  ;;  %v1240_v16 = vmul.f32 %v3558_v30, %v1204_v7  ;;  %v889_v23 = vmul.f32 %v3574_v48, %v3518_v36  ;;  %v1340_v37 = vmul.f32 %v3552_v28, %v1304_v45  ;;  %v3720_v48 = vld [vmem:[%s4834_s6] ss:$0 sm:$0xff] }
 0x127   : > { %v3646_v26 = vpop.f32.mrb[23].mxu0  ;;  %v1969_v22 = vadd.f32 %v1937_v0, %v1869_v32  ;;  %v1471_v34 = vadd.f32 %v1439_v6, %v1371_v47  ;;  %v1539_v39 = vmul.f32 %v3584_v60, %v1205_v4  ;;  %v1838_v21 = vmul.f32 %v3634_v5, %v1205_v4 }
 0x128   : > { %v2106_v24 = vmul.f32 %v3701_v57, %v2067_v56  ;;  %v1570_v41 = vadd.f32 %v1538_v31, %v1470_v53  ;;  %v2037_v43 = vmul.f32 %v3669_v40, %v1404_v10  ;;  %v990_v25 = vmax.f32 %v958_v29, 0.0 }
 0x129   : > { %v2107_v32 = vmul.f32 %v3701_v57, %v2068_v9  ;;  %v1341_v46 = vmul.f32 %v3552_v28, %v1305_v18  ;;  %v1870_v47 = vadd.f32 %v1838_v21, %v1769_v12  ;;  %v989_v0 = vmax.f32 %v957_v14, 0.0  ;;  %v1405_v12 = vld [vmem:[#allocation2 + $0x52] sm:$0xff] }
 0x12a   : > { %v3655_v54 = vpop.f32.mrb[24].mxu0  ;;  %v1638_v6 = vmul.f32 %v3604_v15, %v1304_v45  ;;  %v2069_v56 = vadd.f32 %v2037_v43, %v1969_v22  ;;  %v928_v53 = vadd.f32 %v3523_v38, %v889_v23  ;;  %v888_v31 = vmul.f32 %v3518_v36, %v3577_v51 }
 0x12b   : > { %v3660_v59 = vpop.f32.mrb[25].mxu0  ;;  %v1639_v29 = vmul.f32 %v3604_v15, %v1305_v18  ;;  %v1938_v9 = vmul.f32 %v3639_v50, %v1305_v18  ;;  %v1241_v17 = vmul.f32 %v3558_v30, %v1205_v4  ;;  %v1372_v35 = vadd.f32 %v1340_v37, %v1240_v16  ;;  %v1206_v4 = vld [vmem:[#allocation2 + $0x60] sm:$0xff] }
 0x12c   : > { %v3731_v2 = vadd.f32 %v3720_v48, %v2106_v24  ;;  %v1571_v14 = vadd.f32 %v1539_v39, %v1471_v34  ;;  %v1670_v21 = vadd.f32 %v1638_v6, %v1570_v41  ;;  %v1022_v45 = vmin.f32 %v990_v25, 6.0 }
 0x12d   : > { %v3734_v22 = vadd.f32 %v3720_v48, %v2107_v32  ;;  %v1440_v23 = vmul.f32 %v3568_v44, %v1404_v10  ;;  %v1970_v51 = vadd.f32 %v1938_v9, %v1870_v47  ;;  %v1021_v43 = vmin.f32 %v989_v0, 6.0 }
 0x12e   : > { %v3673_v3 = vpop.f32.mrb[26].mxu0  ;;  %4885 = vst [vmem:[#allocation11_spill] sm:$0xff] %v3731_v2  ;;  %v2108_v18 = vmul.f32 %v3701_v57, %v2069_v56  ;;  %v960_v16 = vadd.f32 3.0, %v928_v53  ;;  %v927_v37 = vadd.f32 %v3523_v38, %v888_v31  ;;  %v1441_v24 = vmul.f32 %v3568_v44, %v1405_v12 }
 0x12f   : > { %v3679_v52 = vpop.f32.mrb[27].mxu0  ;;  %4886 = vst [vmem:[#allocation12_spill] sm:$0xff] %v3734_v22  ;;  %v2038_v34 = vmul.f32 %v3669_v40, %v1405_v12  ;;  %v1373_v39 = vadd.f32 %v1341_v46, %v1241_v17  ;;  %v1472_v41 = vadd.f32 %v1440_v23, %v1372_v35  ;;  %v2177_v25 = vsel %vm1107_vm1, %v3731_v2, 0.0 }
 0x130   : > { %v1671_v32 = vadd.f32 %v1639_v29, %v1571_v14  ;;  %v1054_v0 = vmul.f32 %v1022_v45, %v3677_v49  ;;  %v1540_v56 = vmul.f32 %v3584_v60, %v1206_v4  ;;  %v1053_v31 = vmul.f32 %v1021_v43, %v3683_v8  ;;  %v1207_v49 = vld [vmem:[#allocation2 + $0x68] sm:$0xff] }
 0x131   : > { %v2070_v6 = vadd.f32 %v2038_v34, %v1970_v51  ;;  %v3750_v9 = vadd.f32 %v3720_v48, %v2108_v18  ;;  %v1839_v35 = vmul.f32 %v3634_v5, %v1206_v4  ;;  %v992_v17 = vmax.f32 %v960_v16, 0.0  ;;  %v1307_v18 = vld [vmem:[#allocation2 + $0x69] sm:$0xff] }
 0x132   : > { %v3690_v55 = vpop.f32.mrb[28].mxu0  ;;  %v959_v46 = vadd.f32 3.0, %v927_v37  ;;  %v1739_v29 = vmul.f32 %v3612_v27, %v1405_v12  ;;  %v1086_v23 = vmul.f32 0.16666667, %v1054_v0  ;;  %v1572_v34 = vadd.f32 %v1540_v56, %v1472_v41 }
 0x133   : > { %v3695_v1 = vpop.f32.mrb[29].mxu0  ;;  %4887 = vst [vmem:[#allocation13_spill] sm:$0xff] %v3750_v9  ;;  %v2109_v51 = vmul.f32 %v3701_v57, %v2070_v6  ;;  %v1085_v8 = vmul.f32 0.16666667, %v1053_v31  ;;  %v2180_v43 = vsel %vm1107_vm1, %v3750_v9, 0.0  ;;  %v1024_v12 = vmin.f32 %v992_v17, 6.0 }
 0x134   : > { %1175 = vst.msk [vmem:[#allocation2 + $0x99] sm:$0xff] %vm1107_vm1, %v1086_v23  ;;  %v991_v2 = vmax.f32 %v959_v46, 0.0  ;;  %v1840_v41 = vmul.f32 %v3634_v5, %v1207_v49  ;;  %v1343_v56 = vmul.f32 %v3552_v28, %v1307_v18  ;;  %v1243_v31 = vmul.f32 %v3558_v30, %v1207_v49  ;;  %v1407_v46 = vld [vmem:[#allocation2 + $0x6a] sm:$0xff] }
 0x135   : > { %1174 = vst.msk [vmem:[#allocation2 + $0x91] sm:$0xff] %vm1107_vm1, %v1085_v8  ;;  %v3768_v17 = vadd.f32 %v3720_v48, %v2109_v51  ;;  %v1940_v9 = vmul.f32 %v3639_v50, %v1307_v18 }
 0x136   : > { %v3710_v20 = vpop.f32.mrb[30].mxu0  ;;  %v1023_v6 = vmin.f32 %v991_v2, 6.0  ;;  %v1375_v51 = vadd.f32 %v1343_v56, %v1243_v31  ;;  %v890_v56 = vmul.f32 %v3518_v36, %v3588_v63 }
 0x137   : > { %4883 = vst [vmem:[#allocation9_spill] sm:$0xff] %v3710_v20  ;;  %v3714_v7 = vpop.f32.mrb[31].mxu0  ;;  %4888 = vst [vmem:[#allocation14_spill] sm:$0xff] %v3768_v17 }
 0x138   : > { %4884 = vst [vmem:[#allocation10_spill] sm:$0xff] %v3714_v7  ;;  %v1738_v7 = vmul.f32 %v3612_v27, %v1404_v10  ;;  %v2178_v10 = vsel %vm1107_vm1, %v3734_v22, 0.0  ;;  %v1771_v22 = vadd.f32 %v1739_v29, %v1671_v32  ;;  %v1541_v32 = vmul.f32 %v3584_v60, %v1207_v49 }
 0x139   : > { %v2179_v14 = vadd.f32 %v2178_v10, %v2177_v25  ;;  %v1242_v25 = vmul.f32 %v3558_v30, %v1206_v4  ;;  %v1056_v10 = vmul.f32 %v1024_v12, %v928_v53  ;;  %v1055_v23 = vmul.f32 %v1023_v6, %v927_v37  ;;  %v1208_v12 = vld [vmem:[#allocation2 + $0x78] sm:$0xff] }
 0x13a   : > { %v1770_v47 = vadd.f32 %v1738_v7, %v1670_v21  ;;  %v1306_v7 = vld [vmem:[#allocation2 + $0x61] sm:$0xff]  ;;  %v1473_v21 = vadd.f32 %v1441_v24, %v1373_v39  ;;  %v1872_v4 = vadd.f32 %v1840_v41, %v1771_v22  ;;  %v1443_v49 = vmul.f32 %v3568_v44, %v1407_v46 }
 0x13b   : > { %v1939_v16 = vmul.f32 %v3639_v50, %v1306_v7  ;;  %v1342_v24 = vmul.f32 %v3552_v28, %v1306_v7  ;;  %v1406_v39 = vld [vmem:[#allocation2 + $0x62] sm:$0xff]  ;;  %v2181_v8 = vadd.f32 %v2180_v43, %v2179_v14  ;;  %v1087_v22 = vmul.f32 0.16666667, %v1055_v23 }
 0x13c   : > { %v1871_v45 = vadd.f32 %v1839_v35, %v1770_v47  ;;  %v1640_v47 = vmul.f32 %v3604_v15, %v1306_v7  ;;  %v2039_v29 = vmul.f32 %v3669_v40, %v1406_v39  ;;  %v1088_v7 = vmul.f32 0.16666667, %v1056_v10 }
 0x13d   : > { %v1740_v53 = vmul.f32 %v3612_v27, %v1406_v39  ;;  %v1374_v2 = vadd.f32 %v1342_v24, %v1242_v25  ;;  %v1641_v41 = vmul.f32 %v3604_v15, %v1307_v18  ;;  %v1741_v37 = vmul.f32 %v3612_v27, %v1407_v46  ;;  %1176 = vst.msk [vmem:[#allocation2 + $0xa9] sm:$0xff] %vm1107_vm1, %v1087_v22  ;;  %v1309_v24 = vld [vmem:[#allocation2 + $0x81] sm:$0xff] }
 0x13e   : > { %v1971_v0 = vadd.f32 %v1939_v16, %v1871_v45  ;;  %v1672_v35 = vadd.f32 %v1640_v47, %v1572_v34  ;;  %v1573_v45 = vadd.f32 %v1541_v32, %v1473_v21  ;;  %1177 = vst.msk [vmem:[#allocation2 + $0xb1] sm:$0xff] %vm1107_vm1, %v1088_v7  ;;  %v1972_v47 = vadd.f32 %v1940_v9, %v1872_v4  ;;  %v1409_v32 = vld [vmem:[#allocation2 + $0x82] sm:$0xff]  ;;  %v1408_v22 = vld [vmem:[#allocation2 + $0x7a] sm:$0xff] }
 0x13f   : > { %v1442_v14 = vmul.f32 %v3568_v44, %v1406_v39  ;;  %v2182_v43 = vsel %vm1107_vm1, %v3768_v17, 0.0  ;;  %v2040_v21 = vmul.f32 %v3669_v40, %v1407_v46  ;;  %v1841_v10 = vmul.f32 %v3634_v5, %v1208_v12 }
 0x140   : > { %v2071_v16 = vadd.f32 %v2039_v29, %v1971_v0  ;;  %v1772_v34 = vadd.f32 %v1740_v53, %v1672_v35  ;;  %v2183_v25 = vadd.f32 %v2182_v43, %v2181_v8  ;;  %v1308_v0 = vld [vmem:[#allocation2 + $0x79] sm:$0xff]  ;;  %v891_v9 = vmul.f32 %v3586_v61, %v3518_v36 }
 0x141   : > { %v1474_v18 = vadd.f32 %v1442_v14, %v1374_v2  ;;  %v1673_v6 = vadd.f32 %v1641_v41, %v1573_v45  ;;  %v2072_v31 = vadd.f32 %v2040_v21, %v1972_v47  ;;  %v1209_v35 = vld [vmem:[#allocation2 + $0x80] sm:$0xff]  ;;  %v1475_v4 = vadd.f32 %v1443_v49, %v1375_v51 }
 0x142   : > { %v2110_v39 = vmul.f32 %v3701_v57, %v2071_v16  ;;  %v1542_v46 = vmul.f32 %v3584_v60, %v1208_v12  ;;  %v1873_v29 = vadd.f32 %v1841_v10, %v1772_v34  ;;  %v1345_v7 = vmul.f32 %v3552_v28, %v1309_v24 }
 0x143   : > { %v1445_v23 = vmul.f32 %v3568_v44, %v1409_v32  ;;  %v1244_v8 = vmul.f32 %v3558_v30, %v1208_v12  ;;  %v1344_v61 = vmul.f32 %v3552_v28, %v1308_v0  ;;  %v1643_v53 = vmul.f32 %v3604_v15, %v1309_v24 }
 0x144   : > { %v1942_v2 = vmul.f32 %v3639_v50, %v1309_v24  ;;  %v1941_v63 = vmul.f32 %v3639_v50, %v1308_v0  ;;  %v930_v45 = vadd.f32 %v3523_v38, %v891_v9  ;;  %v3798_v16 = vadd.f32 %v3720_v48, %v2110_v39  ;;  %v3812_v39 = vld [vmem:[#allocation2 + $0x90] sm:$0xff] }
 0x145   : > { %v1543_v49 = vmul.f32 %v3584_v60, %v1209_v35  ;;  %v1773_v51 = vadd.f32 %v1741_v37, %v1673_v6  ;;  %v929_v34 = vadd.f32 %v3523_v38, %v890_v56  ;;  %v2111_v12 = vmul.f32 %v3701_v57, %v2072_v31 }
 0x146   : > { %4889 = vst [vmem:[#allocation15_spill] sm:$0xff] %v3798_v16  ;;  %v1574_v47 = vadd.f32 %v1542_v46, %v1474_v18  ;;  %v1973_v41 = vadd.f32 %v1941_v63, %v1873_v29  ;;  %v893_v14 = vmul.f32 %v3599_v11, %v3518_v36  ;;  %v1245_v43 = vmul.f32 %v3558_v30, %v1209_v35 }
 0x147   : > { %v1376_v21 = vadd.f32 %v1344_v61, %v1244_v8  ;;  %v1842_v24 = vmul.f32 %v3634_v5, %v1209_v35  ;;  %v892_v10 = vmul.f32 %v3518_v36, %v3601_v13  ;;  %v1444_v9 = vmul.f32 %v3568_v44, %v1408_v22 }
 0x148   : > { %v1642_v37 = vmul.f32 %v3604_v15, %v1308_v0  ;;  %v2041_v6 = vmul.f32 %v3669_v40, %v1408_v22  ;;  %v962_v18 = vadd.f32 3.0, %v930_v45  ;;  %v2184_v11 = vsel %vm1107_vm1, %v3798_v16, 0.0 }
 0x149   : > { %v1575_v56 = vadd.f32 %v1543_v49, %v1475_v4  ;;  %v1874_v31 = vadd.f32 %v1842_v24, %v1773_v51  ;;  %v961_v46 = vadd.f32 3.0, %v929_v34  ;;  %v3817_v35 = vadd.f32 %v3720_v48, %v2111_v12  ;;  %v1310_v24 = vld [vmem:[#allocation2 + $0x91] sm:$0xff] }
 0x14a   : > { %v1674_v29 = vadd.f32 %v1642_v37, %v1574_v47  ;;  %v2073_v13 = vadd.f32 %v2041_v6, %v1973_v41  ;;  %v932_v8 = vadd.f32 %v3523_v38, %v893_v14  ;;  %v1377_v61 = vadd.f32 %v1345_v7, %v1245_v43  ;;  %v3826_v41 = vld [vmem:[#allocation2 + $0x98] sm:$0xff] }
 0x14b   : > { %4890 = vst [vmem:[#allocation16_spill] sm:$0xff] %v3817_v35  ;;  %v1476_v0 = vadd.f32 %v1444_v9, %v1376_v21  ;;  %v1544_v63 = vmul.f32 %v3584_v60, %v3812_v39  ;;  %v931_v17 = vadd.f32 %v3523_v38, %v892_v10  ;;  %v2185_v20 = vadd.f32 %v2184_v11, %v2183_v25  ;;  %v3839_v11 = vld [vmem:[#allocation2 + $0x92] sm:$0xff] }
 0x14c   : > { %v1743_v16 = vmul.f32 %v3612_v27, %v1409_v32  ;;  %v1742_v4 = vmul.f32 %v3612_v27, %v1408_v22  ;;  %v994_v49 = vmax.f32 %v962_v18, 0.0  ;;  %v2042_v51 = vmul.f32 %v3669_v40, %v1409_v32 }
 0x14d   : > { %v1675_v12 = vadd.f32 %v1643_v53, %v1575_v56  ;;  %v1974_v47 = vadd.f32 %v1942_v2, %v1874_v31  ;;  %v993_v14 = vmax.f32 %v961_v46, 0.0  ;;  %v2112_v43 = vmul.f32 %v3701_v57, %v2073_v13  ;;  %v1311_v13 = vld [vmem:[#allocation2 + $0x99] sm:$0xff] }
 0x14e   : > { %v1774_v7 = vadd.f32 %v1742_v4, %v1674_v29  ;;  %v2186_v21 = vsel %vm1107_vm1, %v3817_v35, 0.0  ;;  %v964_v25 = vadd.f32 3.0, %v932_v8  ;;  %v1477_v10 = vadd.f32 %v1445_v23, %v1377_v61 }
 0x14f   : > { %v1576_v9 = vadd.f32 %v1544_v63, %v1476_v0  ;;  %v963_v37 = vadd.f32 3.0, %v931_v17  ;;  %v895_v22 = vmul.f32 %v3614_v33, %v3518_v36  ;;  %v3833_v32 = vadd.f32 %v2186_v21, %v2185_v20 }
 0x150   : > { %v1545_v53 = vmul.f32 %v3584_v60, %v3826_v41  ;;  %v1843_v2 = vmul.f32 %v3634_v5, %v3812_v39  ;;  %v1026_v6 = vmin.f32 %v994_v49, 6.0  ;;  %v2074_v18 = vadd.f32 %v2042_v51, %v1974_v47 }
 0x151   : > { %v1644_v56 = vmul.f32 %v3604_v15, %v1310_v24  ;;  %v1775_v23 = vadd.f32 %v1743_v16, %v1675_v12  ;;  %v1025_v31 = vmin.f32 %v993_v14, 6.0  ;;  %v3843_v46 = vadd.f32 %v3720_v48, %v2112_v43 }
 0x152   : > { %v1875_v33 = vadd.f32 %v1843_v2, %v1774_v7  ;;  %v1058_v20 = vmul.f32 %v1026_v6, %v930_v45  ;;  %v996_v29 = vmax.f32 %v964_v25, 0.0  ;;  %v995_v63 = vmax.f32 %v963_v37, 0.0  ;;  %v3853_v25 = vld [vmem:[#allocation2 + $0xa8] sm:$0xff] }
 0x153   : > { %4891 = vst [vmem:[#allocation17_spill] sm:$0xff] %v3843_v46  ;;  %v1676_v61 = vadd.f32 %v1644_v56, %v1576_v9  ;;  %v1057_v0 = vmul.f32 %v1025_v31, %v929_v34  ;;  %v934_v4 = vadd.f32 %v3523_v38, %v895_v22  ;;  %v1577_v49 = vadd.f32 %v1545_v53, %v1477_v10  ;;  %v1411_v9 = vld [vmem:[#allocation2 + $0x9a] sm:$0xff] }
 0x154   : > { %v1744_v51 = vmul.f32 %v3612_v27, %v3839_v11  ;;  %v1090_v47 = vmul.f32 0.16666667, %v1058_v20  ;;  %v1028_v21 = vmin.f32 %v996_v29, 6.0  ;;  %v1943_v16 = vmul.f32 %v3639_v50, %v1310_v24 }
 0x155   : > { %v1089_v12 = vmul.f32 0.16666667, %v1057_v0  ;;  %v1027_v14 = vmin.f32 %v995_v63, 6.0  ;;  %v966_v43 = vadd.f32 3.0, %v934_v4  ;;  %v2113_v45 = vmul.f32 %v3701_v57, %v2074_v18 }
 0x156   : > { %v1645_v7 = vmul.f32 %v3604_v15, %v1311_v13  ;;  %v1844_v34 = vmul.f32 %v3634_v5, %v3826_v41  ;;  %1179 = vst.msk [vmem:[#allocation2 + $0xc9] sm:$0xff] %vm1107_vm1, %v1090_v47  ;;  %v1060_v10 = vmul.f32 %v1028_v21, %v932_v8  ;;  %v1776_v37 = vadd.f32 %v1744_v51, %v1676_v61 }
 0x157   : > { %v1975_v22 = vadd.f32 %v1943_v16, %v1875_v33  ;;  %1178 = vst.msk [vmem:[#allocation2 + $0xc1] sm:$0xff] %vm1107_vm1, %v1089_v12  ;;  %v1059_v53 = vmul.f32 %v1027_v14, %v931_v17  ;;  %v998_v2 = vmax.f32 %v966_v43, 0.0  ;;  %v2188_v6 = vsel %vm1107_vm1, %v3843_v46, 0.0 }
 0x158   : > { %v1677_v18 = vadd.f32 %v1645_v7, %v1577_v49  ;;  %v2043_v56 = vmul.f32 %v3669_v40, %v3839_v11  ;;  %v1092_v31 = vmul.f32 0.16666667, %v1060_v10  ;;  %v1876_v20 = vadd.f32 %v1844_v34, %v1775_v23  ;;  %v3868_v49 = vld [vmem:[#allocation2 + $0xa9] sm:$0xff] }
 0x159   : > { %v1845_v29 = vmul.f32 %v3634_v5, %v3853_v25  ;;  %v1091_v8 = vmul.f32 0.16666667, %v1059_v53  ;;  %v1030_v0 = vmin.f32 %v998_v2, 6.0  ;;  %v1745_v33 = vmul.f32 %v3612_v27, %v1411_v9  ;;  %v1213_v23 = vld [vmem:[#allocation2 + $0xb0] sm:$0xff] }
 0x15a   : > { %v1944_v61 = vmul.f32 %v3639_v50, %v1311_v13  ;;  %v1246_v17 = vmul.f32 %v3558_v30, %v3812_v39  ;;  %v1346_v63 = vmul.f32 %v3552_v28, %v1310_v24  ;;  %1181 = vst.msk [vmem:[#allocation2 + $0xe1] sm:$0xff] %vm1107_vm1, %v1092_v31  ;;  %v2075_v51 = vadd.f32 %v2043_v56, %v1975_v22  ;;  %v1313_v22 = vld [vmem:[#allocation2 + $0xb1] sm:$0xff] }
 0x15b   : > { %v1877_v47 = vadd.f32 %v1845_v29, %v1776_v37  ;;  %1180 = vst.msk [vmem:[#allocation2 + $0xd9] sm:$0xff] %vm1107_vm1, %v1091_v8  ;;  %v1062_v21 = vmul.f32 %v1030_v0, %v934_v4  ;;  %v894_v16 = vmul.f32 %v3518_v36, %v3619_v42  ;;  %v1347_v12 = vmul.f32 %v3552_v28, %v1311_v13  ;;  %v3883_v37 = vld [vmem:[#allocation2 + $0xaa] sm:$0xff] }
 0x15c   : > { %v1247_v39 = vmul.f32 %v3558_v30, %v3826_v41  ;;  %v1777_v14 = vadd.f32 %v1745_v33, %v1677_v18  ;;  %v1976_v24 = vadd.f32 %v1944_v61, %v1876_v20  ;;  %v1945_v43 = vmul.f32 %v3639_v50, %v3868_v49 }
 0x15d   : > { %v1094_v7 = vmul.f32 0.16666667, %v1062_v21  ;;  %v3880_v34 = vadd.f32 %v3720_v48, %v2113_v45  ;;  %v2189_v10 = vadd.f32 %v2188_v6, %v3833_v32  ;;  %v1378_v4 = vadd.f32 %v1346_v63, %v1246_v17  ;;  %v1413_v17 = vld [vmem:[#allocation2 + $0xb2] sm:$0xff] }
 0x15e   : > { %v1846_v42 = vmul.f32 %v3634_v5, %v1213_v23  ;;  %v2044_v13 = vmul.f32 %v3669_v40, %v1411_v9  ;;  %v2114_v41 = vmul.f32 %v3701_v57, %v2075_v51  ;;  %v1977_v53 = vadd.f32 %v1945_v43, %v1877_v47 }
 0x15f   : > { %4892 = vst [vmem:[#allocation18_spill] sm:$0xff] %v3880_v34  ;;  %1183 = vst.msk [vmem:[#allocation2 + $0xf9] sm:$0xff] %vm1107_vm1, %v1094_v7  ;;  %v3890_v2 = vadd.f32 %v3523_v38, %v894_v16  ;;  %v1379_v45 = vadd.f32 %v1347_v12, %v1247_v39  ;;  %v1446_v32 = vmul.f32 %v3568_v44, %v3839_v11  ;;  %v2190_v0 = vsel %vm1107_vm1, %v3880_v34, 0.0 }
 0x160   : > { %v1878_v6 = vadd.f32 %v1846_v42, %v1777_v14  ;;  %v2076_v18 = vadd.f32 %v2044_v13, %v1976_v24  ;;  %v2045_v56 = vmul.f32 %v3669_v40, %v3883_v37  ;;  %v897_v31 = vmul.f32 %v3628_v58, %v3518_v36 }
 0x161   : > { %v896_v20 = vmul.f32 %v3518_v36, %v3630_v62  ;;  %v1447_v29 = vmul.f32 %v3568_v44, %v1411_v9  ;;  %v1478_v8 = vadd.f32 %v1446_v32, %v1378_v4  ;;  %v1946_v33 = vmul.f32 %v3639_v50, %v1313_v22 }
 0x162   : > { %v3905_v11 = vadd.f32 %v3720_v48, %v2114_v41  ;;  %v2191_v61 = vadd.f32 %v2190_v0, %v2189_v10  ;;  %v2077_v63 = vadd.f32 %v2045_v56, %v1977_v53  ;;  %v965_v51 = vadd.f32 3.0, %v3890_v2 }
 0x163   : > { %v1479_v58 = vadd.f32 %v1447_v29, %v1379_v45  ;;  %v1546_v36 = vmul.f32 %v3584_v60, %v3853_v25  ;;  %v1547_v62 = vmul.f32 %v3584_v60, %v1213_v23  ;;  %v1978_v9 = vadd.f32 %v1946_v33, %v1878_v6 }
 0x164   : > { %4893 = vst [vmem:[#allocation19_spill] sm:$0xff] %v3905_v11  ;;  %v2115_v47 = vmul.f32 %v3701_v57, %v2076_v18  ;;  %v1349_v21 = vmul.f32 %v3552_v28, %v1313_v22  ;;  %v936_v16 = vadd.f32 %v3523_v38, %v897_v31  ;;  %v935_v12 = vadd.f32 %v3523_v38, %v896_v20 }
 0x165   : > { %v1449_v39 = vmul.f32 %v3568_v44, %v1413_v17  ;;  %v1647_v14 = vmul.f32 %v3604_v15, %v1313_v22  ;;  %v2046_v24 = vmul.f32 %v3669_v40, %v1413_v17  ;;  %v1248_v43 = vmul.f32 %v3558_v30, %v3853_v25  ;;  %v3932_v25 = vld [vmem:[%s4881_s2] ss:$0 sm:$0xff] }
 0x166   : > { %v2192_v7 = vsel %vm1107_vm1, %v3905_v11, 0.0  ;;  %v1348_v10 = vmul.f32 %v3552_v28, %v3868_v49  ;;  %v2116_v4 = vmul.f32 %v3701_v57, %v2077_v63  ;;  %v997_v42 = vmax.f32 %v965_v51, 0.0 }
 0x167   : > { %v1249_v38 = vmul.f32 %v3558_v30, %v1213_v23  ;;  %v1578_v13 = vadd.f32 %v1546_v36, %v1478_v8  ;;  %v1579_v41 = vadd.f32 %v1547_v62, %v1479_v58  ;;  %v2078_v53 = vadd.f32 %v2046_v24, %v1978_v9 }
 0x168   : > { %v3927_v22 = vadd.f32 %v3720_v48, %v2115_v47  ;;  %v968_v45 = vadd.f32 3.0, %v936_v16  ;;  %v967_v32 = vadd.f32 3.0, %v935_v12  ;;  %v899_v6 = vmul.f32 %v3932_v25, %v3641_v19 }
 0x169   : > { %v2193_v18 = vadd.f32 %v2192_v7, %v2191_v61  ;;  %v1747_v56 = vmul.f32 %v3612_v27, %v1413_v17  ;;  %v1646_v23 = vmul.f32 %v3604_v15, %v3868_v49  ;;  %v898_v31 = vmul.f32 %v3932_v25, %v3646_v26  ;;  %v3952_v26 = vld [vmem:[%s4831_s3] ss:$0 sm:$0xff] }
 0x16a   : > { %4894 = vst [vmem:[#allocation20_spill] sm:$0xff] %v3927_v22  ;;  %v1380_v20 = vadd.f32 %v1348_v10, %v1248_v43  ;;  %v1448_v29 = vmul.f32 %v3568_v44, %v3883_v37  ;;  %v3944_v8 = vadd.f32 %v3720_v48, %v2116_v4  ;;  %v1029_v0 = vmin.f32 %v997_v42, 6.0  ;;  %v1214_v10 = vld [vmem:[#allocation2 + $0xc0] sm:$0xff] }
 0x16b   : > { %v1381_v33 = vadd.f32 %v1349_v21, %v1249_v38  ;;  %v1678_v63 = vadd.f32 %v1646_v23, %v1578_v13  ;;  %v1679_v19 = vadd.f32 %v1647_v14, %v1579_v41  ;;  %v2117_v61 = vmul.f32 %v3701_v57, %v2078_v53 }
 0x16c   : > { %4895 = vst [vmem:[#allocation21_spill] sm:$0xff] %v3944_v8  ;;  %v2194_v17 = vsel %vm1107_vm1, %v3927_v22, 0.0  ;;  %v1000_v49 = vmax.f32 %v968_v45, 0.0  ;;  %v999_v51 = vmax.f32 %v967_v32, 0.0  ;;  %v938_v58 = vadd.f32 %v3952_v26, %v899_v6 }
 0x16d   : > { %v1746_v36 = vmul.f32 %v3612_v27, %v3883_v37  ;;  %v2195_v62 = vadd.f32 %v2194_v17, %v2193_v18  ;;  %v937_v9 = vadd.f32 %v3952_v26, %v898_v31  ;;  %v901_v47 = vmul.f32 %v3932_v25, %v3655_v54  ;;  %v1314_v37 = vld [vmem:[#allocation2 + $0xc1] sm:$0xff]  ;;  %v1315_v18 = vld [vmem:[#allocation2 + $0xc9] sm:$0xff] }
 0x16e   : > { %v1480_v21 = vadd.f32 %v1448_v29, %v1380_v20  ;;  %v2196_v14 = vsel %vm1107_vm1, %v3944_v8, 0.0  ;;  %v1061_v24 = vmul.f32 %v1029_v0, %v3890_v2  ;;  %v3964_v7 = vadd.f32 %v3720_v48, %v2117_v61  ;;  %v1215_v54 = vld [vmem:[#allocation2 + $0xc8] sm:$0xff] }
 0x16f   : > { %v1778_v43 = vadd.f32 %v1746_v36, %v1678_v63  ;;  %v1481_v4 = vadd.f32 %v1449_v39, %v1381_v33  ;;  %v1779_v42 = vadd.f32 %v1747_v56, %v1679_v19  ;;  %v1032_v13 = vmin.f32 %v1000_v49, 6.0  ;;  %v1415_v20 = vld [vmem:[#allocation2 + $0xca] sm:$0xff] }
 0x170   : > { %4896 = vst [vmem:[#allocation22_spill] sm:$0xff] %v3964_v7  ;;  %v1093_v38 = vmul.f32 0.16666667, %v1061_v24  ;;  %v1031_v41 = vmin.f32 %v999_v51, 6.0  ;;  %v970_v53 = vadd.f32 3.0, %v938_v58  ;;  %v3966_v45 = vadd.f32 %v2196_v14, %v2195_v62 }
 0x171   : > { %v969_v32 = vadd.f32 3.0, %v937_v9  ;;  %v3969_v6 = vadd.f32 %v3952_v26, %v901_v47  ;;  %v900_v2 = vmul.f32 %v3932_v25, %v3660_v59  ;;  %v1250_v23 = vmul.f32 %v3558_v30, %v1214_v10 }
 0x172   : > { %4897 = vst [vmem:[#allocation23_spill] sm:$0xff] %v3966_v45  ;;  %1182 = vst.msk [vmem:[#allocation2 + $0xf1] sm:$0xff] %vm1107_vm1, %v1093_v38  ;;  %v1064_v39 = vmul.f32 %v1032_v13, %v936_v16  ;;  %v1063_v56 = vmul.f32 %v1031_v41, %v935_v12  ;;  %v1002_v31 = vmax.f32 %v970_v53, 0.0  ;;  %v1350_v29 = vmul.f32 %v3552_v28, %v1314_v37  ;;  %v1414_v38 = vld [vmem:[#allocation2 + $0xc2] sm:$0xff] }
 0x173   : > { %v1548_v0 = vmul.f32 %v3584_v60, %v1214_v10  ;;  %v1847_v33 = vmul.f32 %v3634_v5, %v1214_v10  ;;  %v1001_v63 = vmax.f32 %v969_v32, 0.0  ;;  %v1848_v19 = vmul.f32 %v3634_v5, %v1215_v54 }
 0x174   : > { %v1096_v61 = vmul.f32 0.16666667, %v1064_v39  ;;  %v1095_v59 = vmul.f32 0.16666667, %v1063_v56  ;;  %v1034_v17 = vmin.f32 %v1002_v31, 6.0  ;;  %v1351_v49 = vmul.f32 %v3552_v28, %v1315_v18 }
 0x175   : > { %v1549_v51 = vmul.f32 %v3584_v60, %v1215_v54  ;;  %v1879_v16 = vadd.f32 %v1847_v33, %v1778_v43  ;;  %v1033_v12 = vmin.f32 %v1001_v63, 6.0  ;;  %v1451_v36 = vmul.f32 %v3568_v44, %v1415_v20 }
 0x176   : > { %v1251_v62 = vmul.f32 %v3558_v30, %v1215_v54  ;;  %v1880_v47 = vadd.f32 %v1848_v19, %v1779_v42  ;;  %1185 = vst.msk [vmem:[#allocation2 + $0x111] sm:$0xff] %vm1107_vm1, %v1096_v61  ;;  %1184 = vst.msk [vmem:[#allocation2 + $0x109] sm:$0xff] %vm1107_vm1, %v1095_v59  ;;  %v1066_v14 = vmul.f32 %v1034_v17, %v938_v58  ;;  %v1317_v54 = vld [vmem:[#allocation2 + $0xe1] sm:$0xff]  ;;  %v1216_v59 = vld [vmem:[#allocation2 + $0xd8] sm:$0xff]  ;;  %v4902_v22 = vmov 0.0|0.0  }
 0x177   : > { %v1649_v24 = vmul.f32 %v3604_v15, %v1315_v18  ;;  %v3987_v10 = vmul.f32 %v3612_v27, %v1415_v20  ;;  %v1947_v13 = vmul.f32 %v3639_v50, %v1314_v37  ;;  %v1065_v43 = vmul.f32 %v1033_v12, %v937_v9  ;;  %v1316_v17 = vld [vmem:[#allocation2 + $0xd9] sm:$0xff] }
 0x178   : > { %v1948_v41 = vmul.f32 %v3639_v50, %v1315_v18  ;;  %v1382_v53 = vadd.f32 %v1350_v29, %v1250_v23  ;;  %v1580_v32 = vadd.f32 %v1548_v0, %v1480_v21  ;;  %v1098_v42 = vmul.f32 0.16666667, %v1066_v14  ;;  %v1417_v23 = vld [vmem:[#allocation2 + $0xe2] sm:$0xff] }
 0x179   : > { %v2048_v39 = vmul.f32 %v3669_v40, %v1415_v20  ;;  %v1581_v56 = vadd.f32 %v1549_v51, %v1481_v4  ;;  %v1979_v31 = vadd.f32 %v1947_v13, %v1879_v16  ;;  %v1097_v58 = vmul.f32 0.16666667, %v1065_v43  ;;  %v1217_v4 = vld [vmem:[#allocation2 + $0xe0] sm:$0xff] }
 0x17a   : > { %v1383_v33 = vadd.f32 %v1351_v49, %v1251_v62  ;;  %v1450_v63 = vmul.f32 %v3568_v44, %v1414_v38  ;;  %v1648_v19 = vmul.f32 %v3604_v15, %v1314_v37  ;;  %v1980_v61 = vadd.f32 %v1948_v41, %v1880_v47  ;;  %1187 = vst.msk [vmem:[#allocation2 + $0x129] sm:$0xff] %vm1107_vm1, %v1098_v42  ;;  %v1416_v43 = vld [vmem:[#allocation2 + $0xda] sm:$0xff] }
 0x17b   : > { %v1748_v9 = vmul.f32 %v3612_v27, %v1414_v38  ;;  %v2047_v21 = vmul.f32 %v3669_v40, %v1414_v38  ;;  %v1353_v18 = vmul.f32 %v3552_v28, %v1317_v54  ;;  %1186 = vst.msk [vmem:[#allocation2 + $0x121] sm:$0xff] %vm1107_vm1, %v1097_v58  ;;  %v972_v20 = vadd.f32 3.0, %v3969_v6 }
 0x17c   : > { %v1482_v29 = vadd.f32 %v1450_v63, %v1382_v53  ;;  %v1680_v0 = vadd.f32 %v1648_v19, %v1580_v32  ;;  %v4001_v37 = vadd.f32 %v3952_v26, %v900_v2  ;;  %v903_v49 = vmul.f32 %v3932_v25, %v3673_v3 }
 0x17d   : > { %v1681_v51 = vadd.f32 %v1649_v24, %v1581_v56  ;;  %v2079_v16 = vadd.f32 %v2047_v21, %v1979_v31  ;;  %v1252_v12 = vmul.f32 %v3558_v30, %v1216_v59  ;;  %v1352_v62 = vmul.f32 %v3552_v28, %v1316_v17 }
 0x17e   : > { %v2080_v47 = vadd.f32 %v2048_v39, %v1980_v61  ;;  %v4008_v14 = vmul.f32 %v3568_v44, %v1417_v23  ;;  %v1253_v38 = vmul.f32 %v3558_v30, %v1217_v4  ;;  %v1550_v13 = vmul.f32 %v3584_v60, %v1216_v59 }
 0x17f   : > { %v1651_v2 = vmul.f32 %v3604_v15, %v1317_v54  ;;  %v1483_v41 = vadd.f32 %v1451_v36, %v1383_v33  ;;  %v1551_v3 = vmul.f32 %v3584_v60, %v1217_v4  ;;  %v1004_v24 = vmax.f32 %v972_v20, 0.0 }
 0x180   : > { %v1780_v53 = vadd.f32 %v1748_v9, %v1680_v0  ;;  %v4015_v32 = vmul.f32 %v3612_v27, %v1417_v23  ;;  %v971_v42 = vadd.f32 3.0, %v4001_v37  ;;  %v942_v39 = vadd.f32 %v3952_v26, %v903_v49 }
 0x181   : > { %v2118_v56 = vmul.f32 %v3701_v57, %v2079_v16  ;;  %v4021_v31 = vmul.f32 %v3639_v50, %v1317_v54  ;;  %v4024_v58 = vmul.f32 %v3669_v40, %v1417_v23  ;;  %v1384_v36 = vadd.f32 %v1352_v62, %v1252_v12 }
 0x182   : > { %v4027_v33 = vmul.f32 %v3701_v57, %v2080_v47  ;;  %v4029_v63 = vadd.f32 %v1353_v18, %v1253_v38  ;;  %v1452_v19 = vmul.f32 %v3568_v44, %v1416_v43  ;;  %v1582_v61 = vadd.f32 %v1550_v13, %v1482_v29  ;;  %v4049_v13 = vld [vmem:[#allocation2 + $0xf9] sm:$0xff] }
 0x183   : > { %v1583_v9 = vadd.f32 %v1551_v3, %v1483_v41  ;;  %v1650_v21 = vmul.f32 %v3604_v15, %v1316_v17  ;;  %v1750_v20 = vmul.f32 %v3612_v27, %v1416_v43  ;;  %v1036_v0 = vmin.f32 %v1004_v24, 6.0  ;;  %v4056_v3 = vld [vmem:[#allocation2 + $0xfa] sm:$0xff] }
 0x184   : > { %4898 = vst [vmem:[#allocation24_spill] sm:$0xff] %v4027_v33  ;;  %v1003_v54 = vmax.f32 %v971_v42, 0.0  ;;  %v974_v49 = vadd.f32 3.0, %v942_v39  ;;  %v902_v23 = vmul.f32 %v3932_v25, %v3679_v52  ;;  %v905_v57 = vmul.f32 %v3932_v25, %v3690_v55 }
 0x185   : > { %v4039_v18 = vadd.f32 %v3720_v48, %v2118_v56  ;;  %v4041_v16 = vadd.f32 %v1452_v19, %v1384_v36  ;;  %v1849_v29 = vmul.f32 %v3634_v5, %v1216_v59  ;;  %v904_v12 = vmul.f32 %v3932_v25, %v3695_v1  ;;  %v4059_v1 = vld [vmem:[#allocation2 + $0xf0] sm:$0xff] }
 0x186   : > { %v1682_v62 = vadd.f32 %v1650_v21, %v1582_v61  ;;  %v1781_v47 = vadd.f32 %v3987_v10, %v1681_v51  ;;  %v1850_v38 = vmul.f32 %v3634_v5, %v1217_v4  ;;  %v1949_v52 = vmul.f32 %v3639_v50, %v1316_v17 }
 0x187   : > { %4899 = vst [vmem:[#allocation25_spill] sm:$0xff] %v4039_v18  ;;  %v4051_v55 = vadd.f32 %v1651_v2, %v1583_v9  ;;  %v1881_v48 = vadd.f32 %v1849_v29, %v1780_v53  ;;  %v4054_v41 = vmul.f32 %v3669_v40, %v1416_v43  ;;  %v1068_v59 = vmul.f32 %v1036_v0, %v3969_v6  ;;  %v4900_v40 = vld [vmem:[#allocation9_spill] sm:$0xff]  ;;  %v4901_v53 = vld [vmem:[#allocation10_spill] sm:$0xff] }
 0x188   : > { %v1035_v24 = vmin.f32 %v1003_v54, 6.0  ;;  %v1006_v10 = vmax.f32 %v974_v49, 0.0  ;;  %v941_v4 = vadd.f32 %v3952_v26, %v902_v23  ;;  %v944_v17 = vadd.f32 %v3952_v26, %v905_v57  ;;  %v2247_v23 = vld [vmem:[%s4835_s7] sm:$0xff]  ;;  %v2248_v57 = vld [vmem:[%s4835_s7 + $0x8] sm:$0xff]  ;;  %v4097_v29 = vld [vmem:[#allocation2 + $0xf1] sm:$0xff] }
 0x189   : > { %v4065_v51 = vmul.f32 %v3552_v28, %v4049_v13  ;;  %v943_v2 = vadd.f32 %v3952_v26, %v904_v12  ;;  %v907_v43 = vmul.f32 %v3932_v25, %v4900_v40  ;;  %v906_v6 = vmul.f32 %v3932_v25, %v4901_v53 }
 0x18a   : > { %v4072_v42 = vadd.f32 %v1750_v20, %v1682_v62  ;;  %v1882_v56 = vadd.f32 %v1850_v38, %v1781_v47  ;;  %v4076_v36 = vmul.f32 %v3568_v44, %v4056_v3  ;;  %v4080_v19 = vmul.f32 %v3604_v15, %v4049_v13 }
 0x18b   : > { %v4082_v61 = vadd.f32 %v1949_v52, %v1881_v48  ;;  %v4086_v9 = vmul.f32 %v3612_v27, %v4056_v3  ;;  %v1254_v25 = vmul.f32 %v3558_v30, %v4059_v1  ;;  %v1100_v21 = vmul.f32 0.16666667, %v1068_v59 }
 0x18c   : > { %v1067_v20 = vmul.f32 %v1035_v24, %v4001_v37  ;;  %v1038_v0 = vmin.f32 %v1006_v10, 6.0  ;;  %v973_v54 = vadd.f32 3.0, %v941_v4  ;;  %v976_v49 = vadd.f32 3.0, %v944_v17  ;;  %v2249_v24 = vld [vmem:[%s4835_s7 + $0x10] sm:$0xff]  ;;  %v2250_v10 = vld [vmem:[%s4835_s7 + $0x18] sm:$0xff] }
 0x18d   : > { %1189 = vst.msk [vmem:[#allocation2 + $0x141] sm:$0xff] %vm1107_vm1, %v1100_v21  ;;  %v975_v12 = vadd.f32 3.0, %v943_v2  ;;  %v946_v62 = vadd.f32 %v3952_v26, %v907_v43  ;;  %v945_v37 = vadd.f32 %v3952_v26, %v906_v6  ;;  %v4854_v59 = vmov 0.0|0.0  }
 0x18e   : > { %v1099_v47 = vmul.f32 0.16666667, %v1067_v20  ;;  %v1070_v38 = vmul.f32 %v1038_v0, %v942_v39  ;;  %v1005_v52 = vmax.f32 %v973_v54, 0.0  ;;  %v1008_v48 = vmax.f32 %v976_v49, 0.0  ;;  %3013 = vmatprep.subr.bf16.mxu1 %v4854_v59  ;;  %v1219_v0 = vld [vmem:[#allocation2 + $0xf8] sm:$0xff] }
 0x18f   : > { %v1007_v40 = vmax.f32 %v975_v12, 0.0  ;;  %v978_v53 = vadd.f32 3.0, %v946_v62  ;;  %v977_v43 = vadd.f32 3.0, %v945_v37  ;;  %v3014_v21 = vpack.c.bf16 %v2248_v57, %v2247_v23 }
 0x190   : > { %v1354_v26 = vmul.f32 %v3552_v28, %v4097_v29  ;;  %1188 = vst.msk [vmem:[#allocation2 + $0x139] sm:$0xff] %vm1107_vm1, %v1099_v47  ;;  %v1102_v39 = vmul.f32 0.16666667, %v1070_v38  ;;  %v1037_v6 = vmin.f32 %v1005_v52, 6.0  ;;  %v1040_v20 = vmin.f32 %v1008_v48, 6.0  ;;  %v2251_v47 = vld [vmem:[%s4835_s7 + $0x20] sm:$0xff] }
 0x191   : > { %v1039_v54 = vmin.f32 %v1007_v40, 6.0  ;;  %v1010_v49 = vmax.f32 %v978_v53, 0.0  ;;  %v1009_v59 = vmax.f32 %v977_v43, 0.0  ;;  %3015 = vmatpush3.bf16.msra.mxu1 %v3014_v21  ;;  %v3017_v8 = vpack.c.bf16 %v2250_v10, %v2249_v24  ;;  %v2252_v38 = vld [vmem:[%s4835_s7 + $0x28] sm:$0xff]  ;;  %v1418_v21 = vld [vmem:[#allocation2 + $0xf2] sm:$0xff] }
 0x192   : > { %v1552_v12 = vmul.f32 %v3584_v60, %v4059_v1  ;;  %1191 = vst.msk [vmem:[#allocation2 + $0x159] sm:$0xff] %vm1107_vm1, %v1102_v39  ;;  %v1069_v23 = vmul.f32 %v1037_v6, %v941_v4  ;;  %v1072_v57 = vmul.f32 %v1040_v20, %v944_v17  ;;  %3016 = vmatprep.subr.bf16.mxu1 %v4902_v22  ;;  %v4903_v40 = vmov 0.0  }
 0x193   : > { %v1982_v52 = vadd.f32 %v4021_v31, %v1882_v56  ;;  %v1071_v48 = vmul.f32 %v1039_v54, %v943_v2  ;;  %v1042_v24 = vmin.f32 %v1010_v49, 6.0  ;;  %v1041_v10 = vmin.f32 %v1009_v59, 6.0  ;;  %2999 = vmatprep.mubr.msk.f32.mxu1 %vm3194_vm3, %v4903_v40  ;;  %v4133_v56 = vld [vmem:[%s4832_s4 + $0x8] ss:$0 sm:$0xff] }
 0x194   : > { %v1485_v4 = vadd.f32 %v4008_v14, %v4029_v63  ;;  %v1553_v17 = vmul.f32 %v3584_v60, %v1219_v0  ;;  %v1101_v53 = vmul.f32 0.16666667, %v1069_v23  ;;  %v1104_v43 = vmul.f32 0.16666667, %v1072_v57  ;;  %4904 = vst [vmem:[#allocation9_spill] sm:$0xff] %v4133_v56  ;;  %v4303_v33 = vld [vmem:[#allocation2 + $0x142] sm:$0xff] }
 0x195   : > { %v1103_v39 = vmul.f32 0.16666667, %v1071_v48  ;;  %v1074_v6 = vmul.f32 %v1042_v24, %v946_v62  ;;  %v1073_v20 = vmul.f32 %v1041_v10, %v945_v37  ;;  %3018 = vmatpush3.bf16.msra.mxu1 %v3017_v8  ;;  %v3020_v31 = vpack.c.bf16 %v2252_v38, %v2251_v47  ;;  %v2253_v8 = vld [vmem:[%s4835_s7 + $0x30] sm:$0xff]  ;;  %v1220_v62 = vld [vmem:[#allocation2 + $0x108] sm:$0xff] }
 0x196   : > { %v1952_v2 = vmul.f32 %v3639_v50, %v4049_v13  ;;  %v4137_v14 = vmul.f32 %v4133_v56, %v4056_v3  ;;  %v1386_v63 = vadd.f32 %v1354_v26, %v1254_v25  ;;  %v1584_v59 = vadd.f32 %v1552_v12, %v4041_v16  ;;  %1190 = vst.msk [vmem:[#allocation2 + $0x151] sm:$0xff] %vm1107_vm1, %v1101_v53  ;;  %v2254_v13 = vld [vmem:[%s4835_s7 + $0x38] sm:$0xff] }
 0x197   : > { %1193 = vst.msk [vmem:[#allocation2 + $0x171] sm:$0xff] %vm1107_vm1, %v1104_v43  ;;  %3019 = vmatprep.subr.bf16.mxu1 %v4902_v22  ;;  %v2081_v3 = vadd.f32 %v4054_v41, %v4082_v61  ;;  %v1255_v25 = vmul.f32 %v3558_v30, %v1219_v0  ;;  %v1851_v16 = vmul.f32 %v3634_v5, %v4059_v1  ;;  %1192 = vst.msk [vmem:[#allocation2 + $0x169] sm:$0xff] %vm1107_vm1, %v1103_v39  ;;  %v1320_v1 = vld [vmem:[#allocation2 + $0x109] sm:$0xff]  ;;  %v1321_v24 = vld [vmem:[#allocation2 + $0x111] sm:$0xff] }
 0x198   : > { %4905 = vst [vmem:[#allocation10_spill] sm:$0xff] %v4137_v14  ;;  %v1106_v37 = vmul.f32 0.16666667, %v1074_v6  ;;  %v1454_v26 = vmul.f32 %v3568_v44, %v1418_v21  ;;  %v1652_v54 = vmul.f32 %v3604_v15, %v4097_v29  ;;  %v1783_v49 = vadd.f32 %v4015_v32, %v4051_v55  ;;  %v1421_v10 = vld [vmem:[#allocation2 + $0x112] sm:$0xff] }
 0x199   : > { %v1105_v12 = vmul.f32 0.16666667, %v1073_v20  ;;  %v4161_v41 = vadd.f32 %v4024_v58, %v1982_v52  ;;  %v1585_v61 = vadd.f32 %v1553_v17, %v1485_v4  ;;  %v1883_v23 = vadd.f32 %v1851_v16, %v4072_v42  ;;  %3021 = vmatpush3.bf16.msra.mxu1 %v3020_v31  ;;  %v4172_v58 = vld [vmem:[%s4833_s5] ss:$0 sm:$0xff]  ;;  %v1221_v4 = vld [vmem:[#allocation2 + $0x110] sm:$0xff] }
 0x19a   : > { %1195 = vst.msk [vmem:[#allocation2 + $0x189] sm:$0xff] %vm1107_vm1, %v1106_v37  ;;  %v3023_v57 = vpack.c.bf16 %v2254_v13, %v2253_v8  ;;  %v1486_v47 = vadd.f32 %v1454_v26, %v1386_v63  ;;  %v1684_v38 = vadd.f32 %v1652_v54, %v1584_v59  ;;  %v1852_v48 = vmul.f32 %v3634_v5, %v1219_v0 }
 0x19b   : > { %4906 = vst [vmem:[#allocation26_spill] sm:$0xff] %v4161_v41  ;;  %v1554_v32 = vmul.f32 %v3584_v60, %v1220_v62  ;;  %1194 = vst.msk [vmem:[#allocation2 + $0x181] sm:$0xff] %vm1107_vm1, %v1105_v12  ;;  %3022 = vmatprep.subr.bf16.mxu1 %v4902_v22  ;;  %v4175_v55 = vmul.f32 %v4172_v58, %v2081_v3  ;;  %v1387_v42 = vadd.f32 %v4065_v51, %v1255_v25  ;;  %v4206_v12 = vld [vmem:[#allocation2 + $0x121] sm:$0xff] }
 0x19c   : > { %4907 = vst [vmem:[#allocation27_spill] sm:$0xff] %v4172_v58  ;;  %v1752_v0 = vmul.f32 %v3612_v27, %v1418_v21  ;;  %v1951_v52 = vmul.f32 %v3639_v50, %v4097_v29  ;;  %v1884_v17 = vadd.f32 %v1852_v48, %v1783_v49  ;;  %v2051_v53 = vmul.f32 %v4133_v56, %v1418_v21  ;;  %v1420_v21 = vld [vmem:[#allocation2 + $0x10a] sm:$0xff]  ;;  %v1222_v49 = vld [vmem:[#allocation2 + $0x120] sm:$0xff] }
 0x19d   : > { %4908 = vst [vmem:[#allocation28_spill] sm:$0xff] %v4175_v55  ;;  %v1256_v43 = vmul.f32 %v3558_v30, %v1220_v62  ;;  %v1356_v39 = vmul.f32 %v3552_v28, %v1320_v1  ;;  %v1685_v6 = vadd.f32 %v4080_v19, %v1585_v61  ;;  %v1357_v31 = vmul.f32 %v3552_v28, %v1321_v24  ;;  %v4317_v58 = vld [vmem:[#allocation2 + $0x15a] sm:$0xff] }
 0x19e   : > { %v1983_v20 = vadd.f32 %v1951_v52, %v1883_v23  ;;  %v4187_v51 = vmul.f32 %v3568_v44, %v1421_v10  ;;  %3024 = vmatpush3.bf16.msra.mxu1 %v3023_v57  ;;  %v1784_v63 = vadd.f32 %v1752_v0, %v1684_v38  ;;  %v4190_v29 = vmul.f32 %v3604_v15, %v1321_v24  ;;  %v4215_v57 = vld [vmem:[#allocation2 + $0x129] sm:$0xff]  ;;  %v4287_v46 = vld [vmem:[#allocation2 + $0x171] sm:$0xff] }
 0x19f   : > { %v1257_v59 = vmul.f32 %v3558_v30, %v1221_v4  ;;  %v1586_v8 = vadd.f32 %v1554_v32, %v1486_v47  ;;  %3025 = vmatprep.subr.bf16.mxu1 %v4902_v22  ;;  %v4195_v13 = vmul.f32 %v3612_v27, %v1421_v10  ;;  %v4198_v19 = vmul.f32 %v3639_v50, %v1321_v24  ;;  %v1223_v24 = vld [vmem:[#allocation2 + $0x128] sm:$0xff] }
 0x1a0   : > { %v1487_v3 = vadd.f32 %v4076_v36, %v1387_v42  ;;  %v1555_v25 = vmul.f32 %v3584_v60, %v1221_v4  ;;  %v4202_v16 = vadd.f32 %v1952_v2, %v1884_v17  ;;  %v1388_v37 = vadd.f32 %v1356_v39, %v1256_v43  ;;  %v4234_v39 = vld [vmem:[#allocation2 + $0x141] sm:$0xff]  ;;  %v4285_v34 = vld [vmem:[#allocation2 + $0x169] sm:$0xff] }
 0x1a1   : > { %4909 = vst [vmem:[#allocation29_spill] sm:$0xff] %v4198_v19  ;;  %v1654_v26 = vmul.f32 %v3604_v15, %v1320_v1  ;;  %v1853_v54 = vmul.f32 %v3634_v5, %v1220_v62  ;;  %v4208_v22 = vadd.f32 %v2051_v53, %v1983_v20  ;;  %v4211_v61 = vmul.f32 %v4133_v56, %v1421_v10  ;;  %v4218_v62 = vld [vmem:[#allocation2 + $0x12a] sm:$0xff] }
 0x1a2   : > { %4910 = vst [vmem:[#allocation30_spill] sm:$0xff] %v4202_v16  ;;  %v1456_v23 = vmul.f32 %v3568_v44, %v1420_v21  ;;  %v1785_v36 = vadd.f32 %v4086_v9, %v1685_v6  ;;  %v1389_v2 = vadd.f32 %v1357_v31, %v1257_v59  ;;  %v1754_v38 = vmul.f32 %v3612_v27, %v1420_v21  ;;  %v4226_v9 = vld [vmem:[#allocation2 + $0x122] sm:$0xff]  ;;  %v4246_v59 = vld [vmem:[#allocation2 + $0x139] sm:$0xff] }
 0x1a3   : > { %4911 = vst [vmem:[#allocation31_spill] sm:$0xff] %v4208_v22  ;;  %4912 = vst [vmem:[#allocation32_spill] sm:$0xff] %v4211_v61  ;;  %v1686_v47 = vadd.f32 %v1654_v26, %v1586_v8  ;;  %v1885_v48 = vadd.f32 %v1853_v54, %v1784_v63  ;;  %v4220_v32 = vadd.f32 %v1555_v25, %v1487_v3  ;;  %v4242_v63 = vld [vmem:[#allocation2 + $0x138] sm:$0xff] }
 0x1a4   : > { %v1854_v42 = vmul.f32 %v3634_v5, %v1221_v4  ;;  %v1258_v10 = vmul.f32 %v3558_v30, %v1222_v49  ;;  %v1358_v0 = vmul.f32 %v3552_v28, %v4206_v12  ;;  %4913 = vst [vmem:[#allocation33_spill] sm:$0xff] %v4226_v9  ;;  %v1488_v52 = vadd.f32 %v1456_v23, %v1388_v37  ;;  %v4258_v37 = vld [vmem:[#allocation2 + $0x150] sm:$0xff]  ;;  %v4260_v26 = vld [vmem:[#allocation2 + $0x159] sm:$0xff] }
 0x1a5   : > { %v1953_v17 = vmul.f32 %v3639_v50, %v1320_v1  ;;  %v4230_v53 = vmul.f32 %v4133_v56, %v1420_v21  ;;  %v1359_v43 = vmul.f32 %v3552_v28, %v4215_v57  ;;  %4915 = vst [vmem:[#allocation35_spill] sm:$0xff] %v4234_v39  ;;  %v1459_v4 = vmul.f32 %v3568_v44, %v4218_v62  ;;  %v4244_v1 = vld [vmem:[#allocation2 + $0x140] sm:$0xff] }
 0x1a6   : > { %v4236_v6 = vadd.f32 %v1854_v42, %v1785_v36  ;;  %v1259_v20 = vmul.f32 %v3558_v30, %v1223_v24  ;;  %v1556_v31 = vmul.f32 %v3584_v60, %v1222_v49  ;;  %v4248_v21 = vadd.f32 %v1754_v38, %v1686_v47  ;;  %v4271_v38 = vld [vmem:[#allocation2 + $0x158] sm:$0xff] }
 0x1a7   : > { %4914 = vst [vmem:[#allocation34_spill] sm:$0xff] %v4230_v53  ;;  %v4250_v8 = vadd.f32 %v1953_v17, %v1885_v48  ;;  %v4254_v3 = vmul.f32 %v3604_v15, %v4215_v57  ;;  %v1458_v25 = vmul.f32 %v3568_v44, %v4226_v9  ;;  %v1390_v54 = vadd.f32 %v1358_v0, %v1258_v10  ;;  %v4273_v48 = vld [vmem:[#allocation2 + $0x168] sm:$0xff]  ;;  %v4275_v42 = vld [vmem:[#allocation2 + $0x151] sm:$0xff] }
 0x1a8   : > { %4916 = vst [vmem:[#allocation36_spill] sm:$0xff] %v4236_v6  ;;  %v1557_v23 = vmul.f32 %v3584_v60, %v1223_v24  ;;  %v4265_v36 = vmul.f32 %v3604_v15, %v4206_v12  ;;  %v4269_v47 = vmul.f32 %v3612_v27, %v4226_v9  ;;  %v1260_v17 = vmul.f32 %v3558_v30, %v4242_v63  ;;  %v4281_v0 = vld [vmem:[#allocation2 + $0x170] sm:$0xff]  ;;  %v4374_v6 = vld [vmem:[#allocation2 + $0x181] sm:$0xff] }
 0x1a9   : > { %4917 = vst [vmem:[#allocation37_spill] sm:$0xff] %v4250_v8  ;;  %v1360_v10 = vmul.f32 %v3552_v28, %v4246_v59  ;;  %v1261_v11 = vmul.f32 %v3558_v30, %v4244_v1  ;;  %v1361_v35 = vmul.f32 %v3552_v28, %v4234_v39  ;;  %v1588_v40 = vadd.f32 %v1556_v31, %v1488_v52  ;;  %v4305_v52 = vld [vmem:[#allocation2 + $0x13a] sm:$0xff]  ;;  %v4326_v8 = vld [vmem:[#allocation2 + $0x152] sm:$0xff] }
 0x1aa   : > { %v4292_v61 = vmul.f32 %v3634_v5, %v1222_v49  ;;  %v1391_v45 = vadd.f32 %v1359_v43, %v1259_v20  ;;  %v1489_v56 = vadd.f32 %v4187_v51, %v1389_v2  ;;  %v1262_v9 = vmul.f32 %v3558_v30, %v4258_v37  ;;  %4919 = vst [vmem:[#allocation39_spill] sm:$0xff] %v4374_v6 }
 0x1ab   : > { %v1263_v18 = vmul.f32 %v3558_v30, %v4271_v38  ;;  %v1362_v7 = vmul.f32 %v3552_v28, %v4275_v42  ;;  %v1363_v55 = vmul.f32 %v3552_v28, %v4260_v26  ;;  %v1264_v49 = vmul.f32 %v3558_v30, %v4273_v48 }
 0x1ac   : > { %v1265_v51 = vmul.f32 %v3558_v30, %v4281_v0  ;;  %v1364_v2 = vmul.f32 %v3552_v28, %v4285_v34  ;;  %v1365_v43 = vmul.f32 %v3552_v28, %v4287_v46  ;;  %v1558_v20 = vmul.f32 %v3584_v60, %v4242_v63 }
 0x1ad   : > { %v1392_v31 = vadd.f32 %v1360_v10, %v1260_v17  ;;  %v1393_v22 = vadd.f32 %v1361_v35, %v1261_v11  ;;  %v1490_v41 = vadd.f32 %v1458_v25, %v1390_v54  ;;  %v4320_v53 = vmul.f32 %v3634_v5, %v1223_v24  ;;  %v4330_v17 = vld [vmem:[#allocation2 + $0x16a] sm:$0xff]  ;;  %v4332_v35 = vld [vmem:[#allocation2 + $0x172] sm:$0xff] }
 0x1ae   : > { %v4324_v30 = vmul.f32 %v3639_v50, %v4206_v12  ;;  %v1461_v28 = vmul.f32 %v3568_v44, %v4303_v33  ;;  %v1491_v14 = vadd.f32 %v1459_v4, %v1391_v45  ;;  %v1394_v16 = vadd.f32 %v1362_v7, %v1262_v9  ;;  %v4344_v9 = vld [vmem:[#allocation2 + $0x188] sm:$0xff] }
 0x1af   : > { %v1395_v19 = vadd.f32 %v1363_v55, %v1263_v18  ;;  %v1460_v11 = vmul.f32 %v3568_v44, %v4305_v52  ;;  %v1589_v24 = vadd.f32 %v1557_v23, %v1489_v56  ;;  %v1396_v25 = vadd.f32 %v1364_v2, %v1264_v49  ;;  %v4342_v55 = vld [vmem:[#allocation2 + $0x180] sm:$0xff] }
 0x1b0   : > { %4918 = vst [vmem:[#allocation38_spill] sm:$0xff] %v4324_v30  ;;  %v1397_v54 = vadd.f32 %v1365_v43, %v1265_v51  ;;  %v1463_v12 = vmul.f32 %v3568_v44, %v4317_v58  ;;  %v1559_v10 = vmul.f32 %v3584_v60, %v4244_v1  ;;  %v1462_v7 = vmul.f32 %v3568_v44, %v4326_v8 }
 0x1b1   : > { %v1492_v45 = vadd.f32 %v1460_v11, %v1392_v31  ;;  %v1493_v18 = vadd.f32 %v1461_v28, %v1393_v22  ;;  %v1590_v4 = vadd.f32 %v1558_v20, %v1490_v41  ;;  %v1464_v56 = vmul.f32 %v3568_v44, %v4330_v17 }
 0x1b2   : > { %v1465_v23 = vmul.f32 %v3568_v44, %v4332_v35  ;;  %v1560_v49 = vmul.f32 %v3584_v60, %v4258_v37  ;;  %v1561_v51 = vmul.f32 %v3584_v60, %v4271_v38  ;;  %v1494_v2 = vadd.f32 %v1462_v7, %v1394_v16 }
 0x1b3   : > { %v1495_v43 = vadd.f32 %v1463_v12, %v1395_v19  ;;  %v1562_v22 = vmul.f32 %v3584_v60, %v4273_v48  ;;  %v1563_v41 = vmul.f32 %v3584_v60, %v4281_v0  ;;  %v1496_v20 = vadd.f32 %v1464_v56, %v1396_v25 }
 0x1b4   : > { %v1497_v31 = vadd.f32 %v1465_v23, %v1397_v54  ;;  %v1564_v28 = vmul.f32 %v3584_v60, %v4342_v55  ;;  %v1565_v44 = vmul.f32 %v3584_v60, %v4344_v9  ;;  %v1659_v11 = vmul.f32 %v3604_v15, %v4234_v39 }
 0x1b5   : > { %v1687_v19 = vadd.f32 %v4190_v29, %v4220_v32  ;;  %v1688_v16 = vadd.f32 %v4265_v36, %v1588_v40  ;;  %v1757_v12 = vmul.f32 %v3612_v27, %v4218_v62  ;;  %v1591_v7 = vadd.f32 %v1559_v10, %v1491_v14  ;;  %v4376_v29 = vld [vmem:[#allocation2 + $0x189] sm:$0xff] }
 0x1b6   : > { %v1658_v25 = vmul.f32 %v3604_v15, %v4246_v59  ;;  %v1661_v54 = vmul.f32 %v3604_v15, %v4260_v26  ;;  %v1689_v60 = vadd.f32 %v4254_v3, %v1589_v24  ;;  %v1592_v56 = vadd.f32 %v1560_v49, %v1492_v45 }
 0x1b7   : > { %v1593_v23 = vadd.f32 %v1561_v51, %v1493_v18  ;;  %v1594_v39 = vadd.f32 %v1562_v22, %v1494_v2  ;;  %v1595_v30 = vadd.f32 %v1563_v41, %v1495_v43  ;;  %v1596_v40 = vadd.f32 %v1564_v28, %v1496_v20  ;;  %v4392_v51 = vld [vmem:[#allocation2 + $0x182] sm:$0xff]  ;;  %v4394_v2 = vld [vmem:[#allocation2 + $0x18a] sm:$0xff] }
 0x1b8   : > { %v1597_v32 = vadd.f32 %v1565_v44, %v1497_v31  ;;  %v1690_v36 = vadd.f32 %v1658_v25, %v1590_v4  ;;  %v1758_v14 = vmul.f32 %v3612_v27, %v4305_v52  ;;  %v1660_v10 = vmul.f32 %v3604_v15, %v4275_v42  ;;  %4920 = vst [vmem:[#allocation40_spill] sm:$0xff] %v4392_v51 }
 0x1b9   : > { %v1662_v3 = vmul.f32 %v3604_v15, %v4285_v34  ;;  %v1663_v24 = vmul.f32 %v3604_v15, %v4287_v46  ;;  %v1759_v45 = vmul.f32 %v3612_v27, %v4303_v33  ;;  %v1664_v18 = vmul.f32 %v3604_v15, %v4374_v6 }
 0x1ba   : > { %v1665_v4 = vmul.f32 %v3604_v15, %v4376_v29  ;;  %v1691_v49 = vadd.f32 %v1659_v11, %v1591_v7  ;;  %v1761_v43 = vmul.f32 %v3612_v27, %v4317_v58  ;;  %v1692_v22 = vadd.f32 %v1660_v10, %v1592_v56 }
 0x1bb   : > { %v1693_v41 = vadd.f32 %v1661_v54, %v1593_v23  ;;  %v1694_v20 = vadd.f32 %v1662_v3, %v1594_v39  ;;  %v1695_v31 = vadd.f32 %v1663_v24, %v1595_v30  ;;  %v1696_v28 = vadd.f32 %v1664_v18, %v1596_v40  ;;  %v1829_v40 = vld [vmem:[#allocation2 + $0x198] sm:$0xff] }
 0x1bc   : > { %v1697_v44 = vadd.f32 %v1665_v4, %v1597_v32  ;;  %v1760_v25 = vmul.f32 %v3612_v27, %v4326_v8  ;;  %v1787_v6 = vadd.f32 %v4195_v13, %v1687_v19  ;;  %v1762_v15 = vmul.f32 %v3612_v27, %v4330_v17  ;;  %v1830_v32 = vld [vmem:[#allocation2 + $0x1a0] sm:$0xff] }
 0x1bd   : > { %v1763_v11 = vmul.f32 %v3612_v27, %v4332_v35  ;;  %v1764_v7 = vmul.f32 %v3612_v27, %v4392_v51  ;;  %v1765_v39 = vmul.f32 %v3612_v27, %v4394_v2  ;;  %v1788_v30 = vadd.f32 %v4269_v47, %v1688_v16 }
 0x1be   : > { %v1789_v54 = vadd.f32 %v1757_v12, %v1689_v60  ;;  %v1790_v56 = vadd.f32 %v1758_v14, %v1690_v36  ;;  %v1791_v23 = vadd.f32 %v1759_v45, %v1691_v49  ;;  %v1792_v13 = vadd.f32 %v1760_v25, %v1692_v22  ;;  %v4926_v25 = vld [vmem:[#allocation37_spill] sm:$0xff] }
 0x1bf   : > { %v1793_v19 = vadd.f32 %v1761_v43, %v1693_v41  ;;  %v1794_v10 = vadd.f32 %v1762_v15, %v1694_v20  ;;  %v1795_v3 = vadd.f32 %v1763_v11, %v1695_v31  ;;  %v1796_v24 = vadd.f32 %v1764_v7, %v1696_v28  ;;  %v4924_v31 = vld [vmem:[#allocation30_spill] sm:$0xff] }
 0x1c0   : > { %v1797_v18 = vadd.f32 %v1765_v39, %v1697_v44  ;;  %v1857_v4 = vmul.f32 %v3634_v5, %v4242_v63  ;;  %v1858_v51 = vmul.f32 %v3634_v5, %v4244_v1  ;;  %v1859_v27 = vmul.f32 %v3634_v5, %v4258_v37  ;;  %v4925_v28 = vld [vmem:[#allocation10_spill] sm:$0xff]  ;;  %v4929_v39 = vld [vmem:[#allocation27_spill] sm:$0xff] }
 0x1c1   : > { %v1860_v47 = vmul.f32 %v3634_v5, %v4271_v38  ;;  %v1865_v16 = vmul.f32 %v3634_v5, %v1829_v40  ;;  %v1866_v12 = vmul.f32 %v3634_v5, %v1830_v32  ;;  %v1861_v60 = vmul.f32 %v3634_v5, %v4273_v48  ;;  %v4927_v15 = vld [vmem:[#allocation34_spill] sm:$0xff]  ;;  %v4932_v40 = vld [vmem:[#allocation28_spill] sm:$0xff] }
 0x1c2   : > { %v1862_v36 = vmul.f32 %v3634_v5, %v4281_v0  ;;  %v1863_v63 = vmul.f32 %v3634_v5, %v4342_v55  ;;  %v1887_v1 = vadd.f32 %v4292_v61, %v4248_v21  ;;  %v1864_v37 = vmul.f32 %v3634_v5, %v4344_v9  ;;  %v4923_v9 = vld [vmem:[#allocation38_spill] sm:$0xff] }
 0x1c3   : > { %v1888_v38 = vadd.f32 %v4320_v53, %v1787_v6  ;;  %v1889_v14 = vadd.f32 %v1857_v4, %v1788_v30  ;;  %v1890_v45 = vadd.f32 %v1858_v51, %v1789_v54  ;;  %v1891_v49 = vadd.f32 %v1859_v27, %v1790_v56  ;;  %v4921_v53 = vld [vmem:[#allocation36_spill] sm:$0xff]  ;;  %v4922_v6 = vld [vmem:[#allocation29_spill] sm:$0xff]  ;;  %v4928_v7 = vld [vmem:[#allocation26_spill] sm:$0xff] }
 0x1c4   : > { %v1892_v43 = vadd.f32 %v1860_v47, %v1791_v23  ;;  %v1893_v22 = vadd.f32 %v1861_v60, %v1792_v13  ;;  %v4431_v48 = vadd.f32 %v1862_v36, %v1793_v19  ;;  %v4433_v41 = vadd.f32 %v1863_v63, %v1794_v10  ;;  %v4930_v54 = vld [vmem:[#allocation31_spill] sm:$0xff]  ;;  %v4931_v56 = vld [vmem:[#allocation24_spill] sm:$0xff]  ;;  %v4933_v13 = vld [vmem:[#allocation22_spill] sm:$0xff] }
 0x1c5   : > { %v4435_v0 = vadd.f32 %v1864_v37, %v1795_v3  ;;  %v4437_v55 = vadd.f32 %v1865_v16, %v1796_v24  ;;  %v4439_v20 = vadd.f32 %v1866_v12, %v1797_v18  ;;  %v1956_v5 = vmul.f32 %v3639_v50, %v4215_v57  ;;  %v4934_v10 = vld [vmem:[#allocation25_spill] sm:$0xff]  ;;  %v4935_v24 = vld [vmem:[#allocation35_spill] sm:$0xff]  ;;  %v4939_v37 = vld [vmem:[#allocation32_spill] sm:$0xff] }
 0x1c6   : > { %v1957_v61 = vmul.f32 %v3639_v50, %v4246_v59  ;;  %v1986_v21 = vadd.f32 %v4922_v6, %v4921_v53  ;;  %v1987_v51 = vadd.f32 %v4923_v9, %v1887_v1  ;;  %v2084_v44 = vadd.f32 %v4925_v28, %v4924_v31  ;;  %v4459_v59 = vld [vmem:[%s4834_s6] ss:$0 sm:$0xff]  ;;  %v4936_v27 = vld [vmem:[#allocation33_spill] sm:$0xff]  ;;  %v4938_v12 = vld [vmem:[#allocation23_spill] sm:$0xff] }
 0x1c7   : > { %v2085_v11 = vadd.f32 %v4927_v15, %v4926_v25  ;;  %v2121_v30 = vmul.f32 %v4929_v39, %v4928_v7  ;;  %v2122_v57 = vmul.f32 %v4929_v39, %v4930_v54  ;;  %v4463_v23 = vadd.f32 %v4459_v59, %v4931_v56  ;;  %v4937_v47 = vld [vmem:[#allocation9_spill] sm:$0xff] }
 0x1c8   : > { %v4467_v32 = vadd.f32 %v4459_v59, %v4932_v40  ;;  %v2198_v19 = vsel %vm1107_vm1, %v4933_v13, 0.0  ;;  %v2200_v3 = vsel %vm1107_vm1, %v4934_v10, 0.0  ;;  %v1958_v18 = vmul.f32 %v3639_v50, %v4935_v24 }
 0x1c9   : > { %v1959_v4 = vmul.f32 %v3639_v50, %v4275_v42  ;;  %v2055_v16 = vmul.f32 %v4937_v47, %v4936_v27  ;;  %v2199_v60 = vadd.f32 %v2198_v19, %v4938_v12  ;;  %v1988_v36 = vadd.f32 %v1956_v5, %v1888_v38 }
 0x1ca   : > { %v1989_v63 = vadd.f32 %v1957_v61, %v1889_v14  ;;  %v2056_v1 = vmul.f32 %v4937_v47, %v4218_v62  ;;  %v2086_v53 = vadd.f32 %v4939_v37, %v1986_v21  ;;  %v2123_v9 = vmul.f32 %v4929_v39, %v2084_v44 }
 0x1cb   : > { %v2087_v6 = vadd.f32 %v2055_v16, %v1987_v51  ;;  %v2124_v31 = vmul.f32 %v4929_v39, %v2085_v11  ;;  %v2201_v28 = vadd.f32 %v2200_v3, %v2199_v60  ;;  %v4486_v42 = vadd.f32 %v4459_v59, %v2121_v30  ;;  %v1929_v3 = vld [vmem:[#allocation2 + $0x199] sm:$0xff] }
 0x1cc   : > { %v4489_v25 = vadd.f32 %v4459_v59, %v2122_v57  ;;  %v2202_v38 = vsel %vm1107_vm1, %v4463_v23, 0.0  ;;  %v2204_v62 = vsel %vm1107_vm1, %v4467_v32, 0.0  ;;  %v1960_v14 = vmul.f32 %v3639_v50, %v4260_v26 }
 0x1cd   : > { %v1961_v5 = vmul.f32 %v3639_v50, %v4285_v34  ;;  %v2057_v61 = vmul.f32 %v4937_v47, %v4305_v52  ;;  %v2203_v21 = vadd.f32 %v2202_v38, %v2201_v28  ;;  %v1990_v51 = vadd.f32 %v1958_v18, %v1890_v45  ;;  %v2029_v38 = vld [vmem:[#allocation2 + $0x19a] sm:$0xff] }
 0x1ce   : > { %v1991_v44 = vadd.f32 %v1959_v4, %v1891_v49  ;;  %v2058_v15 = vmul.f32 %v4937_v47, %v4303_v33  ;;  %v2088_v11 = vadd.f32 %v2056_v1, %v1988_v36  ;;  %v2125_v30 = vmul.f32 %v4929_v39, %v2086_v53  ;;  %v4940_v49 = vld [vmem:[#allocation39_spill] sm:$0xff] }
 0x1cf   : > { %v2089_v7 = vadd.f32 %v2057_v61, %v1989_v63  ;;  %v2126_v54 = vmul.f32 %v4929_v39, %v2087_v6  ;;  %v2205_v57 = vadd.f32 %v2204_v62, %v2203_v21  ;;  %v4506_v26 = vadd.f32 %v4459_v59, %v2123_v9  ;;  %v1930_v53 = vld [vmem:[#allocation2 + $0x1a1] sm:$0xff] }
 0x1d0   : > { %v4509_v34 = vadd.f32 %v4459_v59, %v2124_v31  ;;  %v2206_v52 = vsel %vm1107_vm1, %v4486_v42, 0.0  ;;  %v2208_v45 = vsel %vm1107_vm1, %v4489_v25, 0.0  ;;  %v1962_v33 = vmul.f32 %v3639_v50, %v4287_v46 }
 0x1d1   : > { %v1963_v56 = vmul.f32 %v3639_v50, %v4940_v49  ;;  %v2059_v40 = vmul.f32 %v4937_v47, %v4326_v8  ;;  %v2207_v19 = vadd.f32 %v2206_v52, %v2205_v57  ;;  %v1992_v24 = vadd.f32 %v1960_v14, %v1892_v43  ;;  %v2030_v57 = vld [vmem:[#allocation2 + $0x1a2] sm:$0xff] }
 0x1d2   : > { %v1993_v18 = vadd.f32 %v1961_v5, %v1893_v22  ;;  %v2060_v4 = vmul.f32 %v4937_v47, %v4317_v58  ;;  %v2090_v27 = vadd.f32 %v2058_v15, %v1990_v51  ;;  %v2127_v12 = vmul.f32 %v4929_v39, %v2088_v11  ;;  %v4941_v51 = vld [vmem:[#allocation40_spill] sm:$0xff] }
 0x1d3   : > { %v2091_v16 = vadd.f32 %v2059_v40, %v1991_v44  ;;  %v2128_v60 = vmul.f32 %v4929_v39, %v2089_v7  ;;  %v2209_v46 = vadd.f32 %v2208_v45, %v2207_v19  ;;  %v4526_v36 = vadd.f32 %v4459_v59, %v2125_v30 }
 0x1d4   : > { %v4529_v63 = vadd.f32 %v4459_v59, %v2126_v54  ;;  %v2210_v8 = vsel %vm1107_vm1, %v4506_v26, 0.0  ;;  %v2212_v43 = vsel %vm1107_vm1, %v4509_v34, 0.0  ;;  %v1964_v58 = vmul.f32 %v3639_v50, %v4376_v29 }
 0x1d5   : > { %v1965_v22 = vmul.f32 %v3639_v50, %v1929_v3  ;;  %v2061_v1 = vmul.f32 %v4937_v47, %v4330_v17  ;;  %v2211_v37 = vadd.f32 %v2210_v8, %v2209_v46  ;;  %v1994_v6 = vadd.f32 %v1962_v33, %v4431_v48 }
 0x1d6   : > { %v1995_v9 = vadd.f32 %v1963_v56, %v4433_v41  ;;  %v2062_v31 = vmul.f32 %v4937_v47, %v4332_v35  ;;  %v2092_v28 = vadd.f32 %v2060_v4, %v1992_v24  ;;  %v2129_v14 = vmul.f32 %v4929_v39, %v2090_v27 }
 0x1d7   : > { %v2093_v62 = vadd.f32 %v2061_v1, %v1993_v18  ;;  %v2130_v29 = vmul.f32 %v4929_v39, %v2091_v16  ;;  %v2213_v5 = vadd.f32 %v2212_v43, %v2211_v37  ;;  %v4547_v61 = vadd.f32 %v4459_v59, %v2127_v12 }
 0x1d8   : > { %v4550_v17 = vadd.f32 %v4459_v59, %v2128_v60  ;;  %v2214_v48 = vsel %vm1107_vm1, %v4526_v36, 0.0  ;;  %v2216_v35 = vsel %vm1107_vm1, %v4529_v63, 0.0  ;;  %v1966_v41 = vmul.f32 %v3639_v50, %v1930_v53 }
 0x1d9   : > { %v1996_v21 = vadd.f32 %v1964_v58, %v4435_v0  ;;  %v2063_v44 = vmul.f32 %v4937_v47, %v4941_v51  ;;  %v2215_v15 = vadd.f32 %v2214_v48, %v2213_v5  ;;  %v1997_v11 = vadd.f32 %v1965_v22, %v4437_v55 }
 0x1da   : > { %v2064_v7 = vmul.f32 %v4937_v47, %v4394_v2  ;;  %v2065_v30 = vmul.f32 %v4937_v47, %v2029_v38  ;;  %v2094_v54 = vadd.f32 %v2062_v31, %v1994_v6  ;;  %v2131_v45 = vmul.f32 %v4929_v39, %v2092_v28 }
 0x1db   : > { %v2095_v52 = vadd.f32 %v2063_v44, %v1995_v9  ;;  %v2132_v50 = vmul.f32 %v4929_v39, %v2093_v62  ;;  %v2217_v33 = vadd.f32 %v2216_v35, %v2215_v15  ;;  %v4567_v0 = vadd.f32 %v4459_v59, %v2129_v14 }
 0x1dc   : > { %v4570_v49 = vadd.f32 %v4459_v59, %v2130_v29  ;;  %v2218_v55 = vsel %vm1107_vm1, %v4547_v61, 0.0  ;;  %v2220_v2 = vsel %vm1107_vm1, %v4550_v17, 0.0  ;;  %v1998_v40 = vadd.f32 %v1966_v41, %v4439_v20 }
 0x1dd   : > { %v2219_v56 = vadd.f32 %v2218_v55, %v2217_v33  ;;  %v2066_v19 = vmul.f32 %v4937_v47, %v2030_v57  ;;  %v2096_v3 = vadd.f32 %v2064_v7, %v1996_v21  ;;  %v2097_v24 = vadd.f32 %v2065_v30, %v1997_v11  ;;  %v2255_v55 = vld [vmem:[%s4836_s8] sm:$0x1] }
 0x1de   : > { %v2133_v18 = vmul.f32 %v4929_v39, %v2094_v54  ;;  %v2134_v4 = vmul.f32 %v4929_v39, %v2095_v52  ;;  %v4581_v16 = vadd.f32 %v4459_v59, %v2131_v45  ;;  %v4584_v12 = vadd.f32 %v4459_v59, %v2132_v50  ;;  %v2330_v45 = vld [vmem:[%s4837_s9] sm:$0xff]  ;;  %v2331_v50 = vld [vmem:[%s4837_s9 + $0x8] sm:$0xff] }
 0x1df   : > { %v2221_v27 = vadd.f32 %v2220_v2, %v2219_v56  ;;  %v2222_v60 = vsel %vm1107_vm1, %v4567_v0, 0.0  ;;  %v2224_v20 = vsel %vm1107_vm1, %v4570_v49, 0.0  ;;  %v2098_v46 = vadd.f32 %v2066_v19, %v1998_v40 }
 0x1e0   : > { %v2135_v8 = vmul.f32 %v4929_v39, %v2096_v3  ;;  %v2136_v43 = vmul.f32 %v4929_v39, %v2097_v24  ;;  %v4593_v22 = vadd.f32 %v4459_v59, %v2133_v18  ;;  %v4596_v1 = vadd.f32 %v4459_v59, %v2134_v4  ;;  %v4638_v3 = vld [vmem:[%s4839_s11] sm:$0xff] }
 0x1e1   : > { %v2223_v47 = vadd.f32 %v2222_v60, %v2221_v27  ;;  %v2226_v37 = vsel %vm1107_vm1, %v4581_v16, 0.0  ;;  %v2228_v53 = vsel %vm1107_vm1, %v4584_v12, 0.0  ;;  %v2137_v9 = vmul.f32 %v4929_v39, %v2098_v46  ;;  %2927 = vmatprep.mubr.msk.f32.mxu0 %vm1107_vm1, %v4638_v3  ;;  %v2627_v24 = vld [vmem:[%s4840_s12] sm:$0xff]  ;;  %v2628_v27 = vld [vmem:[%s4840_s12 + $0x8] sm:$0xff] }
 0x1e2   : > { %v4604_v28 = vadd.f32 %v4459_v59, %v2135_v8  ;;  %v4607_v38 = vadd.f32 %v4459_v59, %v2136_v43  ;;  %v2230_v62 = vsel %vm1107_vm1, %v4593_v22, 0.0  ;;  %v2232_v14 = vsel %vm1107_vm1, %v4596_v1, 0.0  ;;  %v2643_v18 = vld [vmem:[%s4841_s13] sm:$0xff]  ;;  %v2644_v60 = vld [vmem:[%s4841_s13 + $0x8] sm:$0xff] }
 0x1e3   : > { %v2225_v58 = vadd.f32 %v2224_v20, %v2223_v47  ;;  %v4614_v48 = vadd.f32 %v4459_v59, %v2137_v9  ;;  %v4942_v52 = vmov 0.0   ;;  %v3026_v33 = vpack.c.bf16 %v2331_v50, %v2330_v45  ;;  %v2332_v20 = vld [vmem:[%s4838_s10] sm:$0x1]  ;;  %v4952_v45 = vld [vmem:[#allocation16_spill] sm:$0xff] }
 0x1e4   : > { %v2234_v39 = vsel %vm1107_vm1, %v4604_v28, 0.0  ;;  %v2236_v35 = vsel %vm1107_vm1, %v4607_v38, 0.0  ;;  %v3195_v4 = vmov 0  }
 0x1e5   : > { %v2227_v6 = vadd.f32 %v2226_v37, %v2225_v58  ;;  %v2238_v51 = vsel %vm1107_vm1, %v4614_v48, 0.0  ;;  %3121 = vset.pattern.permute.xlu0 %v3195_v4  ;;  %3122 = vset.pattern.permute.xlu1 %v3195_v4  ;;  %v4955_v4 = vld [vmem:[#allocation19_spill] sm:$0xff] }
 0x1e6   : > { %2631 = vperm.xlu0 %3121, %v2627_v24   ;;  %2647 = vperm.xlu1 %3122, %v2643_v18  }
 0x1e7   : > { %v2229_v31 = vadd.f32 %v2228_v53, %v2227_v6  ;;  %v4943_v6 = vld [vmem:[#allocation8_spill] sm:$0xff] }
 0x1e8   : > { %v4944_v9 = vsub.s32 0, %v4943_v6 }
 0x1e9   : > { %v2231_v29 = vadd.f32 %v2230_v62, %v2229_v31 }
 0x1ea   : > { %2636 = vperm.xlu0 %3121, %v2628_v27   ;;  %2652 = vperm.xlu1 %3122, %v2644_v60   ;;  %v4956_v60 = vld [vmem:[#allocation20_spill] sm:$0xff] }
 0x1eb   : > { %v2233_v5 = vadd.f32 %v2232_v14, %v2231_v29  ;;  %v4945_v29 = vld [vmem:[#allocation11_spill] sm:$0xff] }
 0x1ed   : > { %v2235_v41 = vadd.f32 %v2234_v39, %v2233_v5  ;;  %v4946_v39 = vld [vmem:[#allocation12_spill] sm:$0xff] }
 0x1ef   : > { %v2237_v21 = vadd.f32 %v2236_v35, %v2235_v41 }
 0x1f1   : > { %v2239_v44 = vadd.f32 %v2238_v51, %v2237_v21 }
 0x1f3   : > { %v2240_v15 = vrot.slane %v2239_v44, 4 }
 0x1f5   : > { %v2241_v11 = vadd.f32 %v2240_v15, %v2239_v44  ;;  %v4949_v15 = vld [vmem:[#allocation13_spill] sm:$0xff] }
 0x1f7   : > { %v2242_v7 = vrot.slane %v2241_v11, 2 }
 0x1f9   : > { %v2243_v30 = vadd.f32 %v2242_v7, %v2241_v11  ;;  %v4950_v7 = vld [vmem:[#allocation14_spill] sm:$0xff] }
 0x1fb   : > { %v2244_v54 = vrot.slane %v2243_v30, 1 }
 0x1fd   : > { %v2245_v57 = vadd.f32 %v2244_v54, %v2243_v30 }
 0x1ff   : > { %v2246_v59 = vmul.f32 0.00390625, %v2245_v57 }
 0x201   : > { %3000 = vmatmul.mubr.msk.f32.vlgmr.msra.gmra.mrb[0].mxu1 %vm1107_vm1, %v2246_v59  ;;  %v4951_v59 = vld [vmem:[#allocation15_spill] sm:$0xff] }
 0x202   : > { %3006 = vmatprep.mubr.msk.f32.mxu1 %vm3194_vm3, %v4942_v52  ;;  %3027 = vmatpush3.bf16.msra.mxu1 %v3026_v33 }
 0x2d4   : > { %v2325_v2 = vpop.f32.mrb[0].mxu1 }
 0x2d5   : > { %v2326_v56 = vadd.f32 %v2325_v2, %v2255_v55  ;;  %v3001_v40 = vpop.f32.mrb[1].mxu1  ;;  %v4953_v2 = vld [vmem:[#allocation17_spill] sm:$0xff] }
 0x2d6   : > { %v4954_v40 = vld [vmem:[#allocation18_spill] sm:$0xff] }
 0x2d7   : > { %v2329_v19 = vmax.f32 %v2326_v56, 0.0 }
 0x2d9   : > { %3007 = vmatmul.mubr.msk.f32.vlgmr.msra.gmra.mrb[2].mxu1 %vm547_vm0, %v2329_v19 }
 0x3ac   : > { %v2402_v47 = vpop.f32.mrb[2].mxu1 }
 0x3ad   : > { %v2403_v46 = vadd.f32 %v2402_v47, %v2332_v20  ;;  %v3008_v8 = vpop.f32.mrb[3].mxu1 }
 0x3ae   : > { %v4957_v8 = vld [vmem:[#allocation21_spill] sm:$0xff] }
 0x3af   : > { %v2406_v43 = vadd.f32 3.0, %v2403_v46 }
 0x3b1   : > { %v2407_v58 = vmax.f32 %v2406_v43, 0.0 }
 0x3b3   : > { %v2408_v37 = vmin.f32 %v2407_v58, 6.0 }
 0x3b5   : > { %v2409_v53 = vmul.f32 0.16666667, %v2408_v37 }
 0x3b7   : > { %v4659_v31 = vrot.slane %v2409_v53, %v4944_v9 }
 0x3b9   : > { %v2430_v62 = vmul.f32 %v4659_v31, %v4489_v25  ;;  %v2431_v14 = vmul.f32 %v4659_v31, %v4506_v26  ;;  %v2414_v5 = vmul.f32 %v4659_v31, %v4945_v29  ;;  %v2415_v35 = vmul.f32 %v4659_v31, %v4946_v39 }
 0x3ba   : > { %v2432_v21 = vmul.f32 %v4659_v31, %v4509_v34  ;;  %v2433_v25 = vmul.f32 %v4659_v31, %v4526_v36  ;;  %v2416_v11 = vmul.f32 %v4659_v31, %v4949_v15  ;;  %v2417_v34 = vmul.f32 %v4659_v31, %v4950_v7  ;;  %v2661_v7 = vld [vmem:[%s512_s17 + $0x10] sm:$0xff] }
 0x3bb   : > { %v3028_v51 = vpack.c.bf16 %v2431_v14, %v2430_v62  ;;  %v3031_v26 = vpack.c.bf16 %v2415_v35, %v2414_v5  ;;  %v2434_v36 = vmul.f32 %v4659_v31, %v4529_v63  ;;  %v2435_v30 = vmul.f32 %v4659_v31, %v4547_v61  ;;  %v2659_v5 = vld [vmem:[%s512_s17] sm:$0xff]  ;;  %v2660_v35 = vld [vmem:[%s512_s17 + $0x8] sm:$0xff] }
 0x3bc   : > { %v3034_v44 = vpack.c.bf16 %v2433_v25, %v2432_v21  ;;  %v3037_v54 = vpack.c.bf16 %v2417_v34, %v2416_v11  ;;  %v2418_v52 = vmul.f32 %v4659_v31, %v4951_v59  ;;  %v2419_v50 = vmul.f32 %v4659_v31, %v4952_v45 }
 0x3bd   : > { %3030 = vmatprep.subr.msk.bf16.mxu0 %vm4671_vm4, %v3028_v51  ;;  %v3040_v57 = vpack.c.bf16 %v2435_v30, %v2434_v36  ;;  %v2436_v63 = vmul.f32 %v4659_v31, %v4550_v17  ;;  %v2437_v61 = vmul.f32 %v4659_v31, %v4567_v0  ;;  %v2420_v56 = vmul.f32 %v4659_v31, %v4953_v2  ;;  %v2662_v30 = vld [vmem:[%s512_s17 + $0x18] sm:$0xff]  ;;  %s3196_s17 = smov [#allocation3]  }
 0x3be   : > { %3033 = vmatpush3.bf16.xpose.msk.msra.mxu0 %vm4671_vm4, %v3031_v26  ;;  %v3043_v33 = vpack.c.bf16 %v2419_v50, %v2418_v52  ;;  %v2421_v19 = vmul.f32 %v4659_v31, %v4954_v40  ;;  %v2438_v17 = vmul.f32 %v4659_v31, %v4570_v49  ;;  %v2439_v0 = vmul.f32 %v4659_v31, %v4581_v16  ;;  %s3132_s1 = sshll.u32 %s3196_s17, 4  ;;  %s3133_s1 = int_to_ptr.vmem [resolvable:$false] %s3132_s1 }
 0x3bf   : > { %3036 = vmatprep.subr.msk.bf16.mxu0 %vm4671_vm4, %v3034_v44  ;;  %v3046_v55 = vpack.c.bf16 %v2437_v61, %v2436_v63  ;;  %v2422_v27 = vmul.f32 %v4659_v31, %v4955_v4  ;;  %v2423_v20 = vmul.f32 %v4659_v31, %v4956_v60  ;;  %v2440_v49 = vmul.f32 %v4659_v31, %v4584_v12  ;;  %s3134_s2 = scalar_lea.vmem %s3133_s1, 1024  ;;  %p3135_p0 = scmp.lt.s32.totalorder %s4778_s26, %s3133_s1 }
 0x3c0   : > { %v3049_v24 = vpack.c.bf16 %v2421_v19, %v2420_v56  ;;  %v3052_v18 = vpack.c.bf16 %v2439_v0, %v2438_v17  ;;  %v2441_v16 = vmul.f32 %v4659_v31, %v4593_v22  ;;  %v2424_v43 = vmul.f32 %v4659_v31, %v4957_v8  ;;  %p3136_p1 = scmp.lt.s32.totalorder %s3134_s2, %s3128_s22 }
 0x3c1   : > { %v3055_v47 = vpack.c.bf16 %v2423_v20, %v2422_v27  ;;  %v2425_v58 = vmul.f32 %v4659_v31, %v4933_v13  ;;  %v2442_v12 = vmul.f32 %v4659_v31, %v4596_v1  ;;  %v2443_v22 = vmul.f32 %v4659_v31, %v4604_v28 }
 0x3c2   : > { %v3058_v46 = vpack.c.bf16 %v2441_v16, %v2440_v49  ;;  %v2426_v6 = vmul.f32 %v4659_v31, %v4934_v10  ;;  %v2427_v13 = vmul.f32 %v4659_v31, %v4463_v23  ;;  %v2444_v1 = vmul.f32 %v4659_v31, %v4607_v38  ;;  %p3137_p2 = por %p3136_p1, %p3135_p0 }
 0x3c3   : > { %v3061_v37 = vpack.c.bf16 %v2425_v58, %v2424_v43  ;;  %v3064_v53 = vpack.c.bf16 %v2443_v22, %v2442_v12  ;;  %v2445_v28 = vmul.f32 %v4659_v31, %v4614_v48  ;;  %v2428_v10 = vmul.f32 %v4659_v31, %v4467_v32  ;;  %v2447_v48 = vld [vmem:[%s4839_s11 + $0x8] sm:$0xff]  ;;  %v2632_v32 = vpop.permute.xlu0 %2631 }
 0x3c4   : > { %v3067_v9 = vpack.c.bf16 %v2427_v13, %v2426_v6  ;;  %v2429_v23 = vmul.f32 %v4659_v31, %v4486_v42  ;;  %v2648_v42 = vpop.permute.xlu1 %2647  ;;  %p3138_p3 = pnand %p3137_p2, %p3131_p13 }
 0x3c5   : > { %v3070_v62 = vpack.c.bf16 %v2445_v28, %v2444_v1 }
 0x3c6   : > { %3039 = vmatpush3.bf16.xpose.msk.msra.mxu0 %vm4671_vm4, %v3037_v54  ;;  %v3073_v38 = vpack.c.bf16 %v2429_v23, %v2428_v10 }
 0x3c7   : > { %3042 = vmatprep.subr.msk.bf16.mxu0 %vm4671_vm4, %v3040_v57  ;;  %v2637_v21 = vpop.permute.xlu0 %2636 }
 0x3c8   : > { %v2653_v11 = vpop.permute.xlu1 %2652 }
 0x3ce   : > { %3045 = vmatpush3.bf16.xpose.msk.msra.mxu0 %vm4671_vm4, %v3043_v33 }
 0x3cf   : > { %3048 = vmatprep.subr.msk.bf16.mxu0 %vm4671_vm4, %v3046_v55 }
 0x3d6   : > { %3051 = vmatpush3.bf16.xpose.msk.msra.mxu0 %vm4671_vm4, %v3049_v24 }
 0x3d7   : > { %3054 = vmatprep.subr.msk.bf16.mxu0 %vm4671_vm4, %v3052_v18 }
 0x3de   : > { %3057 = vmatpush3.bf16.xpose.msk.msra.mxu0 %vm4671_vm4, %v3055_v47 }
 0x3df   : > { %3060 = vmatprep.subr.msk.bf16.mxu0 %vm4671_vm4, %v3058_v46 }
 0x3e6   : > { %3063 = vmatpush3.bf16.xpose.msk.msra.mxu0 %vm4671_vm4, %v3061_v37 }
 0x3e7   : > { %3066 = vmatprep.subr.msk.bf16.mxu0 %vm4671_vm4, %v3064_v53 }
 0x3ee   : > { %3069 = vmatpush3.bf16.xpose.msk.msra.mxu0 %vm4671_vm4, %v3067_v9 }
 0x3ef   : > { %3072 = vmatprep.subr.msk.bf16.mxu0 %vm4671_vm4, %v3070_v62 }
 0x3f6   : > { %3075 = vmatpush3.bf16.xpose.msk.msra.mxu0 %vm4671_vm4, %v3073_v38 }
 0x3fd   : > { %2928 = vmatmul.mubr.msk.f32.vlgmr.msra.gmra.mrb[32].mxu0 %vm1107_vm1, %v4638_v3 }
 0x3fe   : > { %2929 = vmatprep.mubr.msk.f32.mxu0 %vm1107_vm1, %v2447_v48 }
 0x401   : > { %2930 = vmatmul.mubr.msk.f32.gmra.mrb[34].mxu0 %vm1107_vm1, %v2447_v48 }
 0x4d0   : > { %v2616_v31 = vpop.f32.mrb[32].mxu0 }
 0x4d1   : > { %v2639_v14 = vmul.f32 %v2632_v32, %v2616_v31  ;;  %v2618_v29 = vpop.f32.mrb[33].mxu0 }
 0x4d2   : > { %v2640_v39 = vmul.f32 %v2632_v32, %v2618_v29 }
 0x4d3   : > { %v2655_v3 = vadd.f32 %v2648_v42, %v2639_v14 }
 0x4d4   : > { %v2656_v41 = vadd.f32 %v2648_v42, %v2640_v39  ;;  %v2622_v25 = vpop.f32.mrb[34].mxu0 }
 0x4d5   : > { %v2663_v51 = vadd.f32 %v2659_v5, %v2655_v3  ;;  %v2641_v26 = vmul.f32 %v2637_v21, %v2622_v25  ;;  %v2624_v44 = vpop.f32.mrb[35].mxu0 }
 0x4d6   : > { %v2664_v15 = vadd.f32 %v2660_v35, %v2656_v41  ;;  %v2642_v34 = vmul.f32 %v2637_v21, %v2624_v44 }
 0x4d7   : > { %2667 = vst [vmem:[%s502_s25] sm:$0xff] %v2663_v51  ;;  %v2657_v36 = vadd.f32 %v2653_v11, %v2641_v26 }
 0x4d8   : > { %2668 = vst [vmem:[%s502_s25 + $0x8] sm:$0xff] %v2664_v15  ;;  %v2658_v54 = vadd.f32 %v2653_v11, %v2642_v34 }
 0x4d9   : > { %v2665_v57 = vadd.f32 %v2661_v7, %v2657_v36 }
 0x4da   : > { %v2666_v59 = vadd.f32 %v2662_v30, %v2658_v54 }
 0x4db   : > { %2669 = vst [vmem:[%s502_s25 + $0x10] sm:$0xff] %v2665_v57 }
 0x4dc   : > { %2670 = vst [vmem:[%s502_s25 + $0x18] sm:$0xff] %v2666_v59 }
 0x4dd   : > { %3141 = shalt.err (!%p3138_p3)
}
 0x4de   : > { %s3142_s0 = scalar_lea.hbm %s4783_s16, 512  ;;  %s3146_s20 = scalar_lea.hbm %s4843_s15, 1024 }
 0x4df   : > { %p3143_p4 = scmp.ne.s32.totalorder %s4783_s16, %s3142_s0  ;;  %p3147_p9 = scmp.lt.u32.totalorder %s4783_s16, %s4843_s15 }
 0x4e0   : > { %p3148_p10 = scmp.lt.u32.totalorder %s3146_s20, %s3142_s0  ;;  %p3150_p12 = scmp.lt.u32.totalorder %s3142_s0, %s4783_s16 }
 0x4e1   : > { %p3144_p7 = pnand %p3143_p4, %p3317_p5 }
 0x4e2   : > { %p3149_p11 = por %p3148_p10, %p3147_p9 }
 0x4e3   : > { %p3145_p8 = pneg %p3144_p7 }
 0x4e4   : > { %p3151_p13 = por %p3150_p12, %p3149_p11 }
 0x4e6   : > { %p3152_p0 = pnand %p3151_p13, %p3145_p8 }
 0x4e8   : > { %3155 = shalt.err (!%p3152_p0)
}
 0x4e9   : > { %s3197_s2 = smov 256   ;;  %s3198_s22 = smov 16  }
 0x4ea   : > { %3076 = dma.vmem_to_hbm [thread:$0]  (%p3317_p5), %s4778_s26, 512, %s4783_s16, %s4787_s23, %s3197_s2, %s3197_s2, %s3198_s22  }
 0x4eb PF: > { %p3082_p1 = scmp.ge.s32.totalorder %s3190_s21, 2  ;;  %s2700_s17 = sand.u32 1, %s3178_s18  }
 0x4ec   : > { %s2701_s0 = scalar_lea.sflag [#allocation4], %s2700_s17 }
 0x4ed   : > { %p3079_p2 = pnand %p3082_p1, %p3321_p6 }
 0x4ef   : > { %3173 = dma.done.wait (!%p3079_p2), %s2701_s0, 512  }
 0x4f0   : > { %3175 = vsyncadd (!%p3079_p2), %s2701_s0, 4294966784  ;;  %s4958_s25 = sld [smem:[#allocation6_spill]]  ;;  %s4959_s20 = sld [smem:[#allocation7_spill]] }
 0x4f1   : > { %p25_p3 = scmp.ge.s32.totalorder %s3304_s24, 4   ;;  %s4960_s18 = smov %s3182_s19 }
 0x4f2   : > { %s4962_s21 = smov %s3304_s24 }
 0x4f3   :  { %27 = sbr.rel (!%p25_p3) target bundleno = 7 (0x7), region = 120 }
 0x4f6   : > { %s4961_s19 = smov %s4958_s25 }
 0x4fa   :  { %2706 = vsyncpa [#allocation4], 1 }
 0x4fb   :  { %2708 = vsyncpa [#allocation4 + $0x1], 1 }

</bundles_post_ra>
